<compile_context>
chip_gen: v7x
topology: tpu7x:2x2x1
jax: 0.10.0
libtpu: 0.0.40
codegen_flags: <defaults>
</compile_context>

<pallas_src>
import functools
import math

import jax
import jax.numpy as jnp
from jax.experimental import pallas as pl
from jax.experimental.pallas import tpu as pltpu


# ----------------------------------------------------------------------------
# Fused decoder-stack kernel: one grid step = (one batch chunk, one layer)
# ----------------------------------------------------------------------------

def _decoder_stack_kernel(
    x_ref, enc_ref, amask_ref, kpm_ref,
    w_in_ref, b_in_ref, w_dd_ref, vec_ref,
    o_ref, mask_sc,
    *, num_heads, eps=1e-5):
  layer = pl.program_id(1)

  Bc = kpm_ref.shape[0]          # batch elements in this chunk
  L = kpm_ref.shape[2]           # sequence length
  D = x_ref.shape[1]             # model dim
  hd = D // num_heads
  scale = 1.0 / math.sqrt(hd)
  bf16 = jnp.bfloat16
  f32 = jnp.float32

  # Layer 0 of this chunk: seed the carried activation and build the combined
  # additive self-attention mask ONCE (it is constant across layers).
  # o_ref keeps the same block index across the layer axis, so it stays
  # resident in VMEM and only hits HBM when the chunk index changes.
  @pl.when(layer == 0)
  def _():
    o_ref[...] = x_ref[...]
    mask_sc[...] = amask_ref[...][None, :, :] + kpm_ref[...]   # (Bc, L, L)

  y = o_ref[...]                 # (Bc*L, D) carried activation, f32
  enc = enc_ref[...]             # (Bc*L, D) encoder output, f32

  # Packed per-layer params (weights arrive bf16; cast is a no-op then).
  w_in = w_in_ref[0].astype(bf16)    # (2D, 3D): [attn1 in-proj^T ; attn2 in-proj^T]
  w_dd = w_dd_ref[0].astype(bf16)    # (3D, D):  [out1^T ; out2^T ; fc2^T]
  b_in = b_in_ref[0]                 # (2, 3D) f32: [attn1 in bias ; attn2 in bias]
  vecs = vec_ref[0]                  # (9, D)  f32: small vectors (see pack fn)

  w_in1, w_in2 = w_in[:D], w_in[D:]
  w_out1, w_out2, fc2_w = w_dd[:D], w_dd[D:2 * D], w_dd[2 * D:]
  b_in1, b_in2 = b_in[0:1, :], b_in[1:2, :]
  b_out1, b_out2, fc2_b = vecs[0:1], vecs[1:2], vecs[2:3]
  ln1_g, ln1_b = vecs[3:4], vecs[4:5]
  ln2_g, ln2_b = vecs[5:6], vecs[6:7]
  ln3_g, ln3_b = vecs[7:8], vecs[8:9]

  def attention(q, k, v, w_out, b_out, mask):
    # q,k,v: (Bc*L, D) f32; w_out: (D, D) bf16; mask: (Bc, L, L) f32 or None.
    # Per-head contribution to the output projection is accumulated directly
    # (no lane-axis concat of head contexts).
    q3 = q.reshape(Bc, L, D)
    k3 = k.reshape(Bc, L, D)
    v3 = v.reshape(Bc, L, D)
    acc = None
    for h in range(num_heads):
      sl = slice(h * hd, (h + 1) * hd)
      qh = (q3[:, :, sl] * scale).astype(bf16)      # fold 1/sqrt(hd) into q
      kh = k3[:, :, sl].astype(bf16)
      vh = v3[:, :, sl].astype(bf16)
      s = jnp.einsum('bqd,bkd->bqk', qh, kh, preferred_element_type=f32)
      if mask is not None:
        s = s + mask
      s = s - jnp.max(s, axis=-1, keepdims=True)
      p = jnp.exp(s)
      p = p * pl.reciprocal(jnp.sum(p, axis=-1, keepdims=True))  # exact recip
      ctx = jnp.einsum('bqk,bkd->bqd', p.astype(bf16), vh,
                       preferred_element_type=f32)               # (Bc, L, hd)
      contrib = jnp.dot(ctx.reshape(Bc * L, hd).astype(bf16), w_out[sl, :],
                        preferred_element_type=f32)              # (Bc*L, D)
      acc = contrib if acc is None else acc + contrib
    return acc + b_out

  def add_ln(a, b, g, beta):
    s = a + b
    mu = jnp.mean(s, axis=-1, keepdims=True)
    d = s - mu
    var = jnp.mean(d * d, axis=-1, keepdims=True)
    return d * jax.lax.rsqrt(var + eps) * g + beta

  # --- self attention (single fused QKV matmul) + Add & LayerNorm 1 ---
  qkv = jnp.dot(y.astype(bf16), w_in1, preferred_element_type=f32) + b_in1
  a1 = attention(qkv[:, :D], qkv[:, D:2 * D], qkv[:, 2 * D:],
                 w_out1, b_out1, mask_sc[...])
  y = add_ln(y, a1, ln1_g, ln1_b)

  # --- cross attention (q from y, fused KV matmul on enc; no mask) ---
  q2 = jnp.dot(y.astype(bf16), w_in2[:, :D],
               preferred_element_type=f32) + b_in2[:, :D]
  kv2 = jnp.dot(enc.astype(bf16), w_in2[:, D:],
                preferred_element_type=f32) + b_in2[:, D:]
  a2 = attention(q2, kv2[:, :D], kv2[:, D:], w_out2, b_out2, None)
  y = add_ln(y, a2, ln2_g, ln2_b)

  # --- PositionWiseFFN (reference bug: only fc2 is applied) + Add & LN 3 ---
  f = jnp.dot(y.astype(bf16), fc2_w, preferred_element_type=f32) + fc2_b
  y = add_ln(y, f, ln3_g, ln3_b)

  o_ref[...] = y


# ----------------------------------------------------------------------------
# Wrapper
# ----------------------------------------------------------------------------

def _vmem_limit_bytes():
  # Per-generation VMEM budget: ~3/4 of physical capacity, capped at 100 MiB.
  # v5e/v6e (128 MiB) -> 96 MiB; v7x (64 MiB) -> 48 MiB.
  try:
    cap = pltpu.get_tpu_info().vmem_capacity_bytes
  except Exception:
    cap = 64 * 1024 * 1024
  return int(min(100 * 1024 * 1024, (cap * 3) // 4))


def decoder_forward(x, enc_out, attn_mask, key_padding_mask, params,
                    *, num_heads, batch_chunks=1):
  """x, enc_out: (B, L, D); attn_mask: additive float (L, L);
     key_padding_mask: bool (B, L), True = padded.
     batch_chunks: grid-parallel split of the batch (use 2 on v7x to feed
     both TensorCores; keep 1 on v5e/v6e so weights are fetched once)."""
  B, L, D = x.shape
  n_layers = params["w_in"].shape[0]
  assert D % num_heads == 0
  assert B % batch_chunks == 0
  assert L % 8 == 0, "seq len must be a multiple of 8 (f32 sublane tile)"
  Bc = B // batch_chunks

  kpm_add = jnp.where(key_padding_mask, -1e9, 0.0).astype(jnp.float32)
  kpm_add = kpm_add.reshape(B, 1, L)
  amask = attn_mask.astype(jnp.float32)

  # 2-D (B*L, D) activations -> all projection matmuls are plain 2-D matmuls
  # with M = B*L rows (lane-dense output slabs, big MXU tiles).
  x2 = x.astype(jnp.float32).reshape(B * L, D)
  enc2 = enc_out.astype(jnp.float32).reshape(B * L, D)

  kern = functools.partial(_decoder_stack_kernel, num_heads=num_heads)

  chunk2 = lambda c, l: (c, 0)
  chunk3 = lambda c, l: (c, 0, 0)
  layer3 = lambda c, l: (l, 0, 0)

  in_specs = [
      pl.BlockSpec((Bc * L, D), chunk2),            # x (seed activation)
      pl.BlockSpec((Bc * L, D), chunk2),            # encoder output
      pl.BlockSpec((L, L), lambda c, l: (0, 0)),    # additive attention mask
      pl.BlockSpec((Bc, 1, L), chunk3),             # additive key-padding mask
      pl.BlockSpec((1, 2 * D, 3 * D), layer3),      # packed in-proj weights (bf16)
      pl.BlockSpec((1, 2, 3 * D), layer3),          # packed in-proj biases (f32)
      pl.BlockSpec((1, 3 * D, D), layer3),          # packed DxD weights (bf16)
      pl.BlockSpec((1, 9, D), layer3),              # packed biases + LN params
  ]

  out = pl.pallas_call(
      kern,
      out_shape=jax.ShapeDtypeStruct((B * L, D), jnp.float32),
      grid_spec=pltpu.PrefetchScalarGridSpec(
          num_scalar_prefetch=0,
          grid=(batch_chunks, n_layers),            # layers sequential (inner)
          in_specs=in_specs,
          out_specs=pl.BlockSpec((Bc * L, D), chunk2),
          scratch_shapes=[pltpu.VMEM((Bc, L, L), jnp.float32)],  # combined mask
      ),
      compiler_params=pltpu.CompilerParams(
          dimension_semantics=("parallel", "arbitrary"),
          vmem_limit_bytes=_vmem_limit_bytes(),
      ),
  )(x2, enc2, amask, kpm_add,
    params["w_in"], params["b_in"], params["w_dd"], params["vecs"])

  return out.reshape(B, L, D)


# ----------------------------------------------------------------------------
# Deterministic parameter construction (PyTorch-shaped) + one-time packing
# ----------------------------------------------------------------------------

def init_decoder_params(key, decoder_len, d_model):
  """Per-layer parameters in PyTorch nn.Module shapes (weights are (out, in))."""
  def dense(k, shape, scale=0.05):
    return scale * jax.random.normal(k, shape, dtype=jnp.float32)

  layers = []
  for _ in range(decoder_len):
    key, *ks = jax.random.split(key, 13)
    layers.append({
        "attn1_in_w": dense(ks[0], (3 * d_model, d_model)),
        "attn1_in_b": dense(ks[1], (3 * d_model,)),
        "attn1_out_w": dense(ks[2], (d_model, d_model)),
        "attn1_out_b": dense(ks[3], (d_model,)),
        "attn2_in_w": dense(ks[4], (3 * d_model, d_model)),
        "attn2_in_b": dense(ks[5], (3 * d_model,)),
        "attn2_out_w": dense(ks[6], (d_model, d_model)),
        "attn2_out_b": dense(ks[7], (d_model,)),
        "ln1_g": jnp.ones((d_model,), jnp.float32),
        "ln1_b": jnp.zeros((d_model,), jnp.float32),
        "ln2_g": jnp.ones((d_model,), jnp.float32),
        "ln2_b": jnp.zeros((d_model,), jnp.float32),
        "ln3_g": jnp.ones((d_model,), jnp.float32),
        "ln3_b": jnp.zeros((d_model,), jnp.float32),
        # fc1 exists in the module but the reference forward never uses it.
        "fc1_w": dense(ks[8], (d_model, d_model)),
        "fc1_b": dense(ks[9], (d_model,)),
        "fc2_w": dense(ks[10], (d_model, d_model)),
        "fc2_b": dense(ks[11], (d_model,)),
    })
  return layers


def pack_decoder_params(layers, compute_dtype=jnp.bfloat16):
  """Pack per-layer params ONCE: pre-transpose weights (kernel does x @ W^T),
  cast them to bf16 for the MXU, and consolidate every small tensor into two
  stacked arrays so the kernel issues few, large DMAs per layer."""
  def stack(fn):
    return jnp.stack([fn(p) for p in layers], axis=0)

  return {
      # (n, 2D, 3D) bf16: rows [0:D]=attn1 in-proj^T, [D:2D]=attn2 in-proj^T
      "w_in": stack(lambda p: jnp.concatenate(
          [p["attn1_in_w"].T, p["attn2_in_w"].T], axis=0).astype(compute_dtype)),
      # (n, 3D, D) bf16: rows [0:D]=out1^T, [D:2D]=out2^T, [2D:3D]=fc2^T
      "w_dd": stack(lambda p: jnp.concatenate(
          [p["attn1_out_w"].T, p["attn2_out_w"].T, p["fc2_w"].T],
          axis=0).astype(compute_dtype)),
      # (n, 2, 3D) f32: row 0=attn1 in-proj bias, row 1=attn2 in-proj bias
      "b_in": stack(lambda p: jnp.stack(
          [p["attn1_in_b"], p["attn2_in_b"]], axis=0)),
      # (n, 9, D) f32: [out1_b, out2_b, fc2_b, ln1_g, ln1_b, ln2_g, ln2_b,
      #                 ln3_g, ln3_b]
      "vecs": stack(lambda p: jnp.stack(
          [p["attn1_out_b"], p["attn2_out_b"], p["fc2_b"],
           p["ln1_g"], p["ln1_b"], p["ln2_g"], p["ln2_b"],
           p["ln3_g"], p["ln3_b"]], axis=0)),
      # fc1_* intentionally not packed: the reference forward discards fc1/relu.
  }


# ----------------------------------------------------------------------------
# Pure-JAX reference (f32) mirroring the PyTorch module, for validation
# ----------------------------------------------------------------------------

def _reference_forward(x, enc, amask, kpm_bool, layers, num_heads):
  B, L, D = x.shape
  hd = D // num_heads
  kpm = jnp.where(kpm_bool, -1e9, 0.0).astype(jnp.float32)[:, None, None, :]

  def mha(q_in, k_in, v_in, in_w, in_b, out_w, out_b, mask):
    q = q_in @ in_w[:D].T + in_b[:D]
    k = k_in @ in_w[D:2 * D].T + in_b[D:2 * D]
    v = v_in @ in_w[2 * D:].T + in_b[2 * D:]
    split = lambda t: t.reshape(B, -1, num_heads, hd).transpose(0, 2, 1, 3)
    qh, kh, vh = split(q), split(k), split(v)
    s = jnp.einsum('bhqd,bhkd->bhqk', qh, kh) / math.sqrt(hd)
    if mask is not None:
      s = s + mask
    p = jax.nn.softmax(s, axis=-1)
    ctx = jnp.einsum('bhqk,bhkd->bhqd', p, vh).transpose(0, 2, 1, 3)
    return ctx.reshape(B, -1, D) @ out_w.T + out_b

  def ln(t, g, b, eps=1e-5):
    mu = t.mean(-1, keepdims=True)
    var = ((t - mu) ** 2).mean(-1, keepdims=True)
    return (t - mu) * jax.lax.rsqrt(var + eps) * g + b

  y = x
  mask1 = amask[None, None] + kpm
  for p_ in layers:
    a1 = mha(y, y, y, p_["attn1_in_w"], p_["attn1_in_b"],
             p_["attn1_out_w"], p_["attn1_out_b"], mask1)
    y = ln(y + a1, p_["ln1_g"], p_["ln1_b"])
    a2 = mha(y, enc, enc, p_["attn2_in_w"], p_["attn2_in_b"],
             p_["attn2_out_w"], p_["attn2_out_b"], None)
    y = ln(y + a2, p_["ln2_g"], p_["ln2_b"])
    f = y @ p_["fc2_w"].T + p_["fc2_b"]          # reference FFN bug: fc2 only
    y = ln(y + f, p_["ln3_g"], p_["ln3_b"])
  return y


# ----------------------------------------------------------------------------
# Main
# ----------------------------------------------------------------------------

if __name__ == "__main__":
  B, L, D, H = 2, 8, 32, 4
  DECODER_LEN = 2

  root = jax.random.PRNGKey(0)
  kx, ke, kp = jax.random.split(root, 3)

  x = jax.random.normal(kx, (B, L, D), dtype=jnp.float32)
  encoder_output = jax.random.normal(ke, (B, L, D), dtype=jnp.float32)

  # causal additive attention mask (0 on/below diagonal, -1e9 above)
  causal = jnp.triu(jnp.ones((L, L), jnp.float32), k=1) * (-1e9)
  # key padding mask: last two positions of batch element 1 are padded
  key_padding = jnp.zeros((B, L), dtype=bool).at[1, -2:].set(True)

  layer_params = init_decoder_params(kp, DECODER_LEN, D)
  params = pack_decoder_params(layer_params)

  fwd = jax.jit(decoder_forward, static_argnames=("num_heads", "batch_chunks"))
  out = fwd(x, encoder_output, causal, key_padding, params, num_heads=H)
  out = jax.block_until_ready(out)

  assert out.shape == (B, L, D)
  assert bool(jnp.all(jnp.isfinite(out)))

  # Validate against the pure-JAX f32 reference (bf16 MXU path -> loose tol).
  ref = _reference_forward(x, encoder_output, causal, key_padding,
                           layer_params, H)
  assert bool(jnp.allclose(out, ref, atol=5e-2, rtol=5e-2))

  print("KERNEL_OK")
</pallas_src>

<mosaic_0001>
module attributes {stable_mosaic.version = 11 : i64} {
  func.func @_decoder_stack_kernel(%arg0: i32, %arg1: i32, %arg2: memref<16x32xf32, #tpu.memory_space<vmem>>, %arg3: memref<16x32xf32, #tpu.memory_space<vmem>>, %arg4: memref<8x8xf32, #tpu.memory_space<vmem>>, %arg5: memref<2x1x8xf32, #tpu.memory_space<vmem>>, %arg6: memref<1x64x96xbf16, #tpu.memory_space<vmem>>, %arg7: memref<1x2x96xf32, #tpu.memory_space<vmem>>, %arg8: memref<1x96x32xbf16, #tpu.memory_space<vmem>>, %arg9: memref<1x9x32xf32, #tpu.memory_space<vmem>>, %arg10: memref<16x32xf32, #tpu.memory_space<vmem>>, %arg11: memref<2x8x8xf32, #tpu.memory_space<vmem>>) attributes {dimension_semantics = [#tpu.dimension_semantics<parallel>, #tpu.dimension_semantics<arbitrary>], iteration_bounds = array<i64: 1, 2>, scalar_prefetch = 0 : i64, scratch_operands = 1 : i64, tpu.core_type = #tpu.core_type<tc>, window_params = [{transform_indices = @transform_0, window_bounds = array<i64: 16, 32>}, {transform_indices = @transform_1, window_bounds = array<i64: 16, 32>}, {pipeline_mode = #tpu.pipeline_mode<synchronous>, transform_indices = @transform_2, window_bounds = array<i64: 8, 8>}, {transform_indices = @transform_3, window_bounds = array<i64: 2, 1, 8>}, {transform_indices = @transform_4, window_bounds = array<i64: 1, 64, 96>}, {transform_indices = @transform_5, window_bounds = array<i64: 1, 2, 96>}, {transform_indices = @transform_6, window_bounds = array<i64: 1, 96, 32>}, {transform_indices = @transform_7, window_bounds = array<i64: 1, 9, 32>}, {transform_indices = @transform_8, window_bounds = array<i64: 16, 32>}]} {
    %c0_i32 = arith.constant 0 : i32
    %0 = arith.cmpi eq, %arg1, %c0_i32 : i32
    %1 = arith.extui %0 : i1 to i32
    %c0_i32_0 = arith.constant 0 : i32
    %2 = arith.cmpi ne, %1, %c0_i32_0 : i32
    scf.if %2 {
      %c0_87 = arith.constant 0 : index
      %c0_88 = arith.constant 0 : index
      %339 = vector.load %arg2[%c0_87, %c0_88] : memref<16x32xf32, #tpu.memory_space<vmem>>, vector<16x32xf32>
      %c0_89 = arith.constant 0 : index
      %c0_90 = arith.constant 0 : index
      %340 = vector.load %arg10[%c0_89, %c0_90] : memref<16x32xf32, #tpu.memory_space<vmem>>, vector<16x32xf32>
      tpu.vector_store %arg10[%c0_89, %c0_90], %339 {strides = array<i32>} : memref<16x32xf32, #tpu.memory_space<vmem>>, vector<16x32xf32>,
      %c0_91 = arith.constant 0 : index
      %c0_92 = arith.constant 0 : index
      %341 = vector.load %arg4[%c0_91, %c0_92] : memref<8x8xf32, #tpu.memory_space<vmem>>, vector<8x8xf32>
      %342 = vector.shape_cast %341 : vector<8x8xf32> to vector<1x8x8xf32>
      %c0_93 = arith.constant 0 : index
      %c0_94 = arith.constant 0 : index
      %c0_95 = arith.constant 0 : index
      %343 = vector.load %arg5[%c0_93, %c0_94, %c0_95] : memref<2x1x8xf32, #tpu.memory_space<vmem>>, vector<2x1x8xf32>
      %344 = vector.broadcast %342 : vector<1x8x8xf32> to vector<2x8x8xf32>
      %345 = vector.broadcast %343 : vector<2x1x8xf32> to vector<2x8x8xf32>
      %346 = arith.addf %344, %345 : vector<2x8x8xf32>
      %c0_96 = arith.constant 0 : index
      %c0_97 = arith.constant 0 : index
      %c0_98 = arith.constant 0 : index
      %347 = vector.load %arg11[%c0_96, %c0_97, %c0_98] : memref<2x8x8xf32, #tpu.memory_space<vmem>>, vector<2x8x8xf32>
      tpu.vector_store %arg11[%c0_96, %c0_97, %c0_98], %346 {strides = array<i32>} : memref<2x8x8xf32, #tpu.memory_space<vmem>>, vector<2x8x8xf32>,
    } else {
    }
    %c0 = arith.constant 0 : index
    %c0_1 = arith.constant 0 : index
    %3 = vector.load %arg10[%c0, %c0_1] : memref<16x32xf32, #tpu.memory_space<vmem>>, vector<16x32xf32>
    %c0_2 = arith.constant 0 : index
    %c0_3 = arith.constant 0 : index
    %4 = vector.load %arg3[%c0_2, %c0_3] : memref<16x32xf32, #tpu.memory_space<vmem>>, vector<16x32xf32>
    %c0_4 = arith.constant 0 : index
    %c0_5 = arith.constant 0 : index
    %c0_6 = arith.constant 0 : index
    %5 = vector.load %arg6[%c0_4, %c0_5, %c0_6] : memref<1x64x96xbf16, #tpu.memory_space<vmem>>, vector<1x64x96xbf16>
    %6 = vector.shape_cast %5 : vector<1x64x96xbf16> to vector<64x96xbf16>
    %c0_7 = arith.constant 0 : index
    %c0_8 = arith.constant 0 : index
    %c0_9 = arith.constant 0 : index
    %7 = vector.load %arg8[%c0_7, %c0_8, %c0_9] : memref<1x96x32xbf16, #tpu.memory_space<vmem>>, vector<1x96x32xbf16>
    %8 = vector.shape_cast %7 : vector<1x96x32xbf16> to vector<96x32xbf16>
    %c0_10 = arith.constant 0 : index
    %c0_11 = arith.constant 0 : index
    %c0_12 = arith.constant 0 : index
    %9 = vector.load %arg7[%c0_10, %c0_11, %c0_12] : memref<1x2x96xf32, #tpu.memory_space<vmem>>, vector<1x2x96xf32>
    %10 = vector.shape_cast %9 : vector<1x2x96xf32> to vector<2x96xf32>
    %c0_13 = arith.constant 0 : index
    %c0_14 = arith.constant 0 : index
    %c0_15 = arith.constant 0 : index
    %11 = vector.load %arg9[%c0_13, %c0_14, %c0_15] : memref<1x9x32xf32, #tpu.memory_space<vmem>>, vector<1x9x32xf32>
    %12 = vector.shape_cast %11 : vector<1x9x32xf32> to vector<9x32xf32>
    %13 = vector.extract_strided_slice %6 {offsets = [0, 0], sizes = [32, 96], strides = [1, 1]} : vector<64x96xbf16> to vector<32x96xbf16>
    %14 = vector.extract_strided_slice %6 {offsets = [32, 0], sizes = [32, 96], strides = [1, 1]} : vector<64x96xbf16> to vector<32x96xbf16>
    %15 = vector.extract_strided_slice %8 {offsets = [0, 0], sizes = [32, 32], strides = [1, 1]} : vector<96x32xbf16> to vector<32x32xbf16>
    %16 = vector.extract_strided_slice %8 {offsets = [32, 0], sizes = [32, 32], strides = [1, 1]} : vector<96x32xbf16> to vector<32x32xbf16>
    %17 = vector.extract_strided_slice %8 {offsets = [64, 0], sizes = [32, 32], strides = [1, 1]} : vector<96x32xbf16> to vector<32x32xbf16>
    %18 = vector.extract_strided_slice %10 {offsets = [0, 0], sizes = [1, 96], strides = [1, 1]} : vector<2x96xf32> to vector<1x96xf32>
    %19 = vector.extract_strided_slice %10 {offsets = [1, 0], sizes = [1, 96], strides = [1, 1]} : vector<2x96xf32> to vector<1x96xf32>
    %20 = vector.extract_strided_slice %12 {offsets = [0, 0], sizes = [1, 32], strides = [1, 1]} : vector<9x32xf32> to vector<1x32xf32>
    %21 = vector.extract_strided_slice %12 {offsets = [1, 0], sizes = [1, 32], strides = [1, 1]} : vector<9x32xf32> to vector<1x32xf32>
    %22 = vector.extract_strided_slice %12 {offsets = [2, 0], sizes = [1, 32], strides = [1, 1]} : vector<9x32xf32> to vector<1x32xf32>
    %23 = vector.extract_strided_slice %12 {offsets = [3, 0], sizes = [1, 32], strides = [1, 1]} : vector<9x32xf32> to vector<1x32xf32>
    %24 = vector.extract_strided_slice %12 {offsets = [4, 0], sizes = [1, 32], strides = [1, 1]} : vector<9x32xf32> to vector<1x32xf32>
    %25 = vector.extract_strided_slice %12 {offsets = [5, 0], sizes = [1, 32], strides = [1, 1]} : vector<9x32xf32> to vector<1x32xf32>
    %26 = vector.extract_strided_slice %12 {offsets = [6, 0], sizes = [1, 32], strides = [1, 1]} : vector<9x32xf32> to vector<1x32xf32>
    %27 = vector.extract_strided_slice %12 {offsets = [7, 0], sizes = [1, 32], strides = [1, 1]} : vector<9x32xf32> to vector<1x32xf32>
    %28 = vector.extract_strided_slice %12 {offsets = [8, 0], sizes = [1, 32], strides = [1, 1]} : vector<9x32xf32> to vector<1x32xf32>
    %29 = arith.truncf %3 : vector<16x32xf32> to vector<16x32xbf16>
    %cst = arith.constant dense<0.000000e+00> : vector<16x96xf32>
    %30 = tpu.matmul %29, %13, %cst {dimension_numbers = #tpu.dot_dimension_numbers<[1], [0], [0], [1], [0, 0, 1, 1], [], []>} : vector<16x32xbf16>, vector<32x96xbf16>, vector<16x96xf32> -> vector<16x96xf32>
    %31 = vector.broadcast %18 : vector<1x96xf32> to vector<16x96xf32>
    %32 = arith.addf %30, %31 : vector<16x96xf32>
    %33 = vector.extract_strided_slice %32 {offsets = [0, 0], sizes = [16, 32], strides = [1, 1]} : vector<16x96xf32> to vector<16x32xf32>
    %34 = vector.extract_strided_slice %32 {offsets = [0, 32], sizes = [16, 32], strides = [1, 1]} : vector<16x96xf32> to vector<16x32xf32>
    %35 = vector.extract_strided_slice %32 {offsets = [0, 64], sizes = [16, 32], strides = [1, 1]} : vector<16x96xf32> to vector<16x32xf32>
    %c0_16 = arith.constant 0 : index
    %c0_17 = arith.constant 0 : index
    %c0_18 = arith.constant 0 : index
    %36 = vector.load %arg11[%c0_16, %c0_17, %c0_18] : memref<2x8x8xf32, #tpu.memory_space<vmem>>, vector<2x8x8xf32>
    %37 = vector.shape_cast %33 : vector<16x32xf32> to vector<2x8x32xf32>
    %38 = vector.shape_cast %34 : vector<16x32xf32> to vector<2x8x32xf32>
    %39 = vector.shape_cast %35 : vector<16x32xf32> to vector<2x8x32xf32>
    %40 = vector.extract_strided_slice %37 {offsets = [0, 0, 0], sizes = [2, 8, 8], strides = [1, 1, 1]} : vector<2x8x32xf32> to vector<2x8x8xf32>
    %cst_19 = arith.constant 0.353553385 : f32
    %41 = vector.broadcast %cst_19 : f32 to vector<2x8x8xf32>
    %42 = arith.mulf %40, %41 : vector<2x8x8xf32>
    %43 = arith.truncf %42 : vector<2x8x8xf32> to vector<2x8x8xbf16>
    %44 = vector.extract_strided_slice %38 {offsets = [0, 0, 0], sizes = [2, 8, 8], strides = [1, 1, 1]} : vector<2x8x32xf32> to vector<2x8x8xf32>
    %45 = arith.truncf %44 : vector<2x8x8xf32> to vector<2x8x8xbf16>
    %46 = vector.extract_strided_slice %39 {offsets = [0, 0, 0], sizes = [2, 8, 8], strides = [1, 1, 1]} : vector<2x8x32xf32> to vector<2x8x8xf32>
    %47 = arith.truncf %46 : vector<2x8x8xf32> to vector<2x8x8xbf16>
    "tpu.trace_start"() <{level = 10 : i32, message = "bqd,bkd->bqk"}> : () -> ()
    %cst_20 = arith.constant dense<0.000000e+00> : vector<2x8x8xf32>
    %48 = tpu.matmul %43, %45, %cst_20 {dimension_numbers = #tpu.dot_dimension_numbers<[2], [2], [1], [1], [0, 0, 0, 1, 1, 1], [0], [0]>} : vector<2x8x8xbf16>, vector<2x8x8xbf16>, vector<2x8x8xf32> -> vector<2x8x8xf32>
    "tpu.trace_stop"() : () -> ()
    %49 = arith.addf %48, %36 : vector<2x8x8xf32>
    %cst_21 = arith.constant dense<0xFF800000> : vector<2x8xf32>
    %50 = vector.multi_reduction <maximumf>, %49, %cst_21 [2] : vector<2x8x8xf32> to vector<2x8xf32>
    %51 = vector.shape_cast %50 : vector<2x8xf32> to vector<2x8x1xf32>
    %52 = vector.broadcast %51 : vector<2x8x1xf32> to vector<2x8x8xf32>
    %53 = arith.subf %49, %52 : vector<2x8x8xf32>
    %54 = math.exp %53 : vector<2x8x8xf32>
    %cst_22 = arith.constant dense<0.000000e+00> : vector<2x8xf32>
    %55 = vector.multi_reduction <add>, %54, %cst_22 [2] : vector<2x8x8xf32> to vector<2x8xf32>
    %56 = vector.shape_cast %55 : vector<2x8xf32> to vector<2x8x1xf32>
    %57 = tpu.reciprocal %56 : vector<2x8x1xf32> -> vector<2x8x1xf32>
    %58 = vector.broadcast %57 : vector<2x8x1xf32> to vector<2x8x8xf32>
    %59 = arith.mulf %54, %58 : vector<2x8x8xf32>
    %60 = arith.truncf %59 : vector<2x8x8xf32> to vector<2x8x8xbf16>
    "tpu.trace_start"() <{level = 10 : i32, message = "bqk,bkd->bqd"}> : () -> ()
    %cst_23 = arith.constant dense<0.000000e+00> : vector<2x8x8xf32>
    %61 = tpu.matmul %60, %47, %cst_23 {dimension_numbers = #tpu.dot_dimension_numbers<[2], [1], [1], [2], [0, 0, 0, 1, 1, 2], [0], [0]>} : vector<2x8x8xbf16>, vector<2x8x8xbf16>, vector<2x8x8xf32> -> vector<2x8x8xf32>
    "tpu.trace_stop"() : () -> ()
    %62 = vector.shape_cast %61 : vector<2x8x8xf32> to vector<16x8xf32>
    %63 = arith.truncf %62 : vector<16x8xf32> to vector<16x8xbf16>
    %64 = vector.extract_strided_slice %15 {offsets = [0, 0], sizes = [8, 32], strides = [1, 1]} : vector<32x32xbf16> to vector<8x32xbf16>
    %cst_24 = arith.constant dense<0.000000e+00> : vector<16x32xf32>
    %65 = tpu.matmul %63, %64, %cst_24 {dimension_numbers = #tpu.dot_dimension_numbers<[1], [0], [0], [1], [0, 0, 1, 1], [], []>} : vector<16x8xbf16>, vector<8x32xbf16>, vector<16x32xf32> -> vector<16x32xf32>
    %66 = vector.extract_strided_slice %37 {offsets = [0, 0, 8], sizes = [2, 8, 8], strides = [1, 1, 1]} : vector<2x8x32xf32> to vector<2x8x8xf32>
    %cst_25 = arith.constant 0.353553385 : f32
    %67 = vector.broadcast %cst_25 : f32 to vector<2x8x8xf32>
    %68 = arith.mulf %66, %67 : vector<2x8x8xf32>
    %69 = arith.truncf %68 : vector<2x8x8xf32> to vector<2x8x8xbf16>
    %70 = vector.extract_strided_slice %38 {offsets = [0, 0, 8], sizes = [2, 8, 8], strides = [1, 1, 1]} : vector<2x8x32xf32> to vector<2x8x8xf32>
    %71 = arith.truncf %70 : vector<2x8x8xf32> to vector<2x8x8xbf16>
    %72 = vector.extract_strided_slice %39 {offsets = [0, 0, 8], sizes = [2, 8, 8], strides = [1, 1, 1]} : vector<2x8x32xf32> to vector<2x8x8xf32>
    %73 = arith.truncf %72 : vector<2x8x8xf32> to vector<2x8x8xbf16>
    "tpu.trace_start"() <{level = 10 : i32, message = "bqd,bkd->bqk"}> : () -> ()
    %cst_26 = arith.constant dense<0.000000e+00> : vector<2x8x8xf32>
    %74 = tpu.matmul %69, %71, %cst_26 {dimension_numbers = #tpu.dot_dimension_numbers<[2], [2], [1], [1], [0, 0, 0, 1, 1, 1], [0], [0]>} : vector<2x8x8xbf16>, vector<2x8x8xbf16>, vector<2x8x8xf32> -> vector<2x8x8xf32>
    "tpu.trace_stop"() : () -> ()
    %75 = arith.addf %74, %36 : vector<2x8x8xf32>
    %cst_27 = arith.constant dense<0xFF800000> : vector<2x8xf32>
    %76 = vector.multi_reduction <maximumf>, %75, %cst_27 [2] : vector<2x8x8xf32> to vector<2x8xf32>
    %77 = vector.shape_cast %76 : vector<2x8xf32> to vector<2x8x1xf32>
    %78 = vector.broadcast %77 : vector<2x8x1xf32> to vector<2x8x8xf32>
    %79 = arith.subf %75, %78 : vector<2x8x8xf32>
    %80 = math.exp %79 : vector<2x8x8xf32>
    %cst_28 = arith.constant dense<0.000000e+00> : vector<2x8xf32>
    %81 = vector.multi_reduction <add>, %80, %cst_28 [2] : vector<2x8x8xf32> to vector<2x8xf32>
    %82 = vector.shape_cast %81 : vector<2x8xf32> to vector<2x8x1xf32>
    %83 = tpu.reciprocal %82 : vector<2x8x1xf32> -> vector<2x8x1xf32>
    %84 = vector.broadcast %83 : vector<2x8x1xf32> to vector<2x8x8xf32>
    %85 = arith.mulf %80, %84 : vector<2x8x8xf32>
    %86 = arith.truncf %85 : vector<2x8x8xf32> to vector<2x8x8xbf16>
    "tpu.trace_start"() <{level = 10 : i32, message = "bqk,bkd->bqd"}> : () -> ()
    %cst_29 = arith.constant dense<0.000000e+00> : vector<2x8x8xf32>
    %87 = tpu.matmul %86, %73, %cst_29 {dimension_numbers = #tpu.dot_dimension_numbers<[2], [1], [1], [2], [0, 0, 0, 1, 1, 2], [0], [0]>} : vector<2x8x8xbf16>, vector<2x8x8xbf16>, vector<2x8x8xf32> -> vector<2x8x8xf32>
    "tpu.trace_stop"() : () -> ()
    %88 = vector.shape_cast %87 : vector<2x8x8xf32> to vector<16x8xf32>
    %89 = arith.truncf %88 : vector<16x8xf32> to vector<16x8xbf16>
    %90 = vector.extract_strided_slice %15 {offsets = [8, 0], sizes = [8, 32], strides = [1, 1]} : vector<32x32xbf16> to vector<8x32xbf16>
    %cst_30 = arith.constant dense<0.000000e+00> : vector<16x32xf32>
    %91 = tpu.matmul %89, %90, %cst_30 {dimension_numbers = #tpu.dot_dimension_numbers<[1], [0], [0], [1], [0, 0, 1, 1], [], []>} : vector<16x8xbf16>, vector<8x32xbf16>, vector<16x32xf32> -> vector<16x32xf32>
    %92 = arith.addf %65, %91 : vector<16x32xf32>
    %93 = vector.extract_strided_slice %37 {offsets = [0, 0, 16], sizes = [2, 8, 8], strides = [1, 1, 1]} : vector<2x8x32xf32> to vector<2x8x8xf32>
    %cst_31 = arith.constant 0.353553385 : f32
    %94 = vector.broadcast %cst_31 : f32 to vector<2x8x8xf32>
    %95 = arith.mulf %93, %94 : vector<2x8x8xf32>
    %96 = arith.truncf %95 : vector<2x8x8xf32> to vector<2x8x8xbf16>
    %97 = vector.extract_strided_slice %38 {offsets = [0, 0, 16], sizes = [2, 8, 8], strides = [1, 1, 1]} : vector<2x8x32xf32> to vector<2x8x8xf32>
    %98 = arith.truncf %97 : vector<2x8x8xf32> to vector<2x8x8xbf16>
    %99 = vector.extract_strided_slice %39 {offsets = [0, 0, 16], sizes = [2, 8, 8], strides = [1, 1, 1]} : vector<2x8x32xf32> to vector<2x8x8xf32>
    %100 = arith.truncf %99 : vector<2x8x8xf32> to vector<2x8x8xbf16>
    "tpu.trace_start"() <{level = 10 : i32, message = "bqd,bkd->bqk"}> : () -> ()
    %cst_32 = arith.constant dense<0.000000e+00> : vector<2x8x8xf32>
    %101 = tpu.matmul %96, %98, %cst_32 {dimension_numbers = #tpu.dot_dimension_numbers<[2], [2], [1], [1], [0, 0, 0, 1, 1, 1], [0], [0]>} : vector<2x8x8xbf16>, vector<2x8x8xbf16>, vector<2x8x8xf32> -> vector<2x8x8xf32>
    "tpu.trace_stop"() : () -> ()
    %102 = arith.addf %101, %36 : vector<2x8x8xf32>
    %cst_33 = arith.constant dense<0xFF800000> : vector<2x8xf32>
    %103 = vector.multi_reduction <maximumf>, %102, %cst_33 [2] : vector<2x8x8xf32> to vector<2x8xf32>
    %104 = vector.shape_cast %103 : vector<2x8xf32> to vector<2x8x1xf32>
    %105 = vector.broadcast %104 : vector<2x8x1xf32> to vector<2x8x8xf32>
    %106 = arith.subf %102, %105 : vector<2x8x8xf32>
    %107 = math.exp %106 : vector<2x8x8xf32>
    %cst_34 = arith.constant dense<0.000000e+00> : vector<2x8xf32>
    %108 = vector.multi_reduction <add>, %107, %cst_34 [2] : vector<2x8x8xf32> to vector<2x8xf32>
    %109 = vector.shape_cast %108 : vector<2x8xf32> to vector<2x8x1xf32>
    %110 = tpu.reciprocal %109 : vector<2x8x1xf32> -> vector<2x8x1xf32>
    %111 = vector.broadcast %110 : vector<2x8x1xf32> to vector<2x8x8xf32>
    %112 = arith.mulf %107, %111 : vector<2x8x8xf32>
    %113 = arith.truncf %112 : vector<2x8x8xf32> to vector<2x8x8xbf16>
    "tpu.trace_start"() <{level = 10 : i32, message = "bqk,bkd->bqd"}> : () -> ()
    %cst_35 = arith.constant dense<0.000000e+00> : vector<2x8x8xf32>
    %114 = tpu.matmul %113, %100, %cst_35 {dimension_numbers = #tpu.dot_dimension_numbers<[2], [1], [1], [2], [0, 0, 0, 1, 1, 2], [0], [0]>} : vector<2x8x8xbf16>, vector<2x8x8xbf16>, vector<2x8x8xf32> -> vector<2x8x8xf32>
    "tpu.trace_stop"() : () -> ()
    %115 = vector.shape_cast %114 : vector<2x8x8xf32> to vector<16x8xf32>
    %116 = arith.truncf %115 : vector<16x8xf32> to vector<16x8xbf16>
    %117 = vector.extract_strided_slice %15 {offsets = [16, 0], sizes = [8, 32], strides = [1, 1]} : vector<32x32xbf16> to vector<8x32xbf16>
    %cst_36 = arith.constant dense<0.000000e+00> : vector<16x32xf32>
    %118 = tpu.matmul %116, %117, %cst_36 {dimension_numbers = #tpu.dot_dimension_numbers<[1], [0], [0], [1], [0, 0, 1, 1], [], []>} : vector<16x8xbf16>, vector<8x32xbf16>, vector<16x32xf32> -> vector<16x32xf32>
    %119 = arith.addf %92, %118 : vector<16x32xf32>
    %120 = vector.extract_strided_slice %37 {offsets = [0, 0, 24], sizes = [2, 8, 8], strides = [1, 1, 1]} : vector<2x8x32xf32> to vector<2x8x8xf32>
    %cst_37 = arith.constant 0.353553385 : f32
    %121 = vector.broadcast %cst_37 : f32 to vector<2x8x8xf32>
    %122 = arith.mulf %120, %121 : vector<2x8x8xf32>
    %123 = arith.truncf %122 : vector<2x8x8xf32> to vector<2x8x8xbf16>
    %124 = vector.extract_strided_slice %38 {offsets = [0, 0, 24], sizes = [2, 8, 8], strides = [1, 1, 1]} : vector<2x8x32xf32> to vector<2x8x8xf32>
    %125 = arith.truncf %124 : vector<2x8x8xf32> to vector<2x8x8xbf16>
    %126 = vector.extract_strided_slice %39 {offsets = [0, 0, 24], sizes = [2, 8, 8], strides = [1, 1, 1]} : vector<2x8x32xf32> to vector<2x8x8xf32>
    %127 = arith.truncf %126 : vector<2x8x8xf32> to vector<2x8x8xbf16>
    "tpu.trace_start"() <{level = 10 : i32, message = "bqd,bkd->bqk"}> : () -> ()
    %cst_38 = arith.constant dense<0.000000e+00> : vector<2x8x8xf32>
    %128 = tpu.matmul %123, %125, %cst_38 {dimension_numbers = #tpu.dot_dimension_numbers<[2], [2], [1], [1], [0, 0, 0, 1, 1, 1], [0], [0]>} : vector<2x8x8xbf16>, vector<2x8x8xbf16>, vector<2x8x8xf32> -> vector<2x8x8xf32>
    "tpu.trace_stop"() : () -> ()
    %129 = arith.addf %128, %36 : vector<2x8x8xf32>
    %cst_39 = arith.constant dense<0xFF800000> : vector<2x8xf32>
    %130 = vector.multi_reduction <maximumf>, %129, %cst_39 [2] : vector<2x8x8xf32> to vector<2x8xf32>
    %131 = vector.shape_cast %130 : vector<2x8xf32> to vector<2x8x1xf32>
    %132 = vector.broadcast %131 : vector<2x8x1xf32> to vector<2x8x8xf32>
    %133 = arith.subf %129, %132 : vector<2x8x8xf32>
    %134 = math.exp %133 : vector<2x8x8xf32>
    %cst_40 = arith.constant dense<0.000000e+00> : vector<2x8xf32>
    %135 = vector.multi_reduction <add>, %134, %cst_40 [2] : vector<2x8x8xf32> to vector<2x8xf32>
    %136 = vector.shape_cast %135 : vector<2x8xf32> to vector<2x8x1xf32>
    %137 = tpu.reciprocal %136 : vector<2x8x1xf32> -> vector<2x8x1xf32>
    %138 = vector.broadcast %137 : vector<2x8x1xf32> to vector<2x8x8xf32>
    %139 = arith.mulf %134, %138 : vector<2x8x8xf32>
    %140 = arith.truncf %139 : vector<2x8x8xf32> to vector<2x8x8xbf16>
    "tpu.trace_start"() <{level = 10 : i32, message = "bqk,bkd->bqd"}> : () -> ()
    %cst_41 = arith.constant dense<0.000000e+00> : vector<2x8x8xf32>
    %141 = tpu.matmul %140, %127, %cst_41 {dimension_numbers = #tpu.dot_dimension_numbers<[2], [1], [1], [2], [0, 0, 0, 1, 1, 2], [0], [0]>} : vector<2x8x8xbf16>, vector<2x8x8xbf16>, vector<2x8x8xf32> -> vector<2x8x8xf32>
    "tpu.trace_stop"() : () -> ()
    %142 = vector.shape_cast %141 : vector<2x8x8xf32> to vector<16x8xf32>
    %143 = arith.truncf %142 : vector<16x8xf32> to vector<16x8xbf16>
    %144 = vector.extract_strided_slice %15 {offsets = [24, 0], sizes = [8, 32], strides = [1, 1]} : vector<32x32xbf16> to vector<8x32xbf16>
    %cst_42 = arith.constant dense<0.000000e+00> : vector<16x32xf32>
    %145 = tpu.matmul %143, %144, %cst_42 {dimension_numbers = #tpu.dot_dimension_numbers<[1], [0], [0], [1], [0, 0, 1, 1], [], []>} : vector<16x8xbf16>, vector<8x32xbf16>, vector<16x32xf32> -> vector<16x32xf32>
    %146 = arith.addf %119, %145 : vector<16x32xf32>
    %147 = vector.broadcast %20 : vector<1x32xf32> to vector<16x32xf32>
    %148 = arith.addf %146, %147 : vector<16x32xf32>
    %149 = arith.addf %3, %148 : vector<16x32xf32>
    %cst_43 = arith.constant dense<0.000000e+00> : vector<16xf32>
    %150 = vector.multi_reduction <add>, %149, %cst_43 [1] : vector<16x32xf32> to vector<16xf32>
    %151 = vector.shape_cast %150 : vector<16xf32> to vector<16x1xf32>
    %cst_44 = arith.constant 3.200000e+01 : f32
    %152 = vector.broadcast %cst_44 : f32 to vector<16x1xf32>
    %153 = arith.divf %151, %152 : vector<16x1xf32>
    %154 = vector.broadcast %153 : vector<16x1xf32> to vector<16x32xf32>
    %155 = arith.subf %149, %154 : vector<16x32xf32>
    %156 = arith.mulf %155, %155 : vector<16x32xf32>
    %cst_45 = arith.constant dense<0.000000e+00> : vector<16xf32>
    %157 = vector.multi_reduction <add>, %156, %cst_45 [1] : vector<16x32xf32> to vector<16xf32>
    %158 = vector.shape_cast %157 : vector<16xf32> to vector<16x1xf32>
    %cst_46 = arith.constant 3.200000e+01 : f32
    %159 = vector.broadcast %cst_46 : f32 to vector<16x1xf32>
    %160 = arith.divf %158, %159 : vector<16x1xf32>
    %cst_47 = arith.constant 9.99999974E-6 : f32
    %161 = vector.broadcast %cst_47 : f32 to vector<16x1xf32>
    %162 = arith.addf %160, %161 : vector<16x1xf32>
    %163 = math.rsqrt %162 : vector<16x1xf32>
    %164 = vector.broadcast %163 : vector<16x1xf32> to vector<16x32xf32>
    %165 = arith.mulf %155, %164 : vector<16x32xf32>
    %166 = vector.broadcast %23 : vector<1x32xf32> to vector<16x32xf32>
    %167 = arith.mulf %165, %166 : vector<16x32xf32>
    %168 = vector.broadcast %24 : vector<1x32xf32> to vector<16x32xf32>
    %169 = arith.addf %167, %168 : vector<16x32xf32>
    %170 = arith.truncf %169 : vector<16x32xf32> to vector<16x32xbf16>
    %171 = vector.extract_strided_slice %14 {offsets = [0, 0], sizes = [32, 32], strides = [1, 1]} : vector<32x96xbf16> to vector<32x32xbf16>
    %cst_48 = arith.constant dense<0.000000e+00> : vector<16x32xf32>
    %172 = tpu.matmul %170, %171, %cst_48 {dimension_numbers = #tpu.dot_dimension_numbers<[1], [0], [0], [1], [0, 0, 1, 1], [], []>} : vector<16x32xbf16>, vector<32x32xbf16>, vector<16x32xf32> -> vector<16x32xf32>
    %173 = vector.extract_strided_slice %19 {offsets = [0, 0], sizes = [1, 32], strides = [1, 1]} : vector<1x96xf32> to vector<1x32xf32>
    %174 = vector.broadcast %173 : vector<1x32xf32> to vector<16x32xf32>
    %175 = arith.addf %172, %174 : vector<16x32xf32>
    %176 = arith.truncf %4 : vector<16x32xf32> to vector<16x32xbf16>
    %177 = vector.extract_strided_slice %14 {offsets = [0, 32], sizes = [32, 64], strides = [1, 1]} : vector<32x96xbf16> to vector<32x64xbf16>
    %cst_49 = arith.constant dense<0.000000e+00> : vector<16x64xf32>
    %178 = tpu.matmul %176, %177, %cst_49 {dimension_numbers = #tpu.dot_dimension_numbers<[1], [0], [0], [1], [0, 0, 1, 1], [], []>} : vector<16x32xbf16>, vector<32x64xbf16>, vector<16x64xf32> -> vector<16x64xf32>
    %179 = vector.extract_strided_slice %19 {offsets = [0, 32], sizes = [1, 64], strides = [1, 1]} : vector<1x96xf32> to vector<1x64xf32>
    %180 = vector.broadcast %179 : vector<1x64xf32> to vector<16x64xf32>
    %181 = arith.addf %178, %180 : vector<16x64xf32>
    %182 = vector.extract_strided_slice %181 {offsets = [0, 0], sizes = [16, 32], strides = [1, 1]} : vector<16x64xf32> to vector<16x32xf32>
    %183 = vector.extract_strided_slice %181 {offsets = [0, 32], sizes = [16, 32], strides = [1, 1]} : vector<16x64xf32> to vector<16x32xf32>
    %184 = vector.shape_cast %175 : vector<16x32xf32> to vector<2x8x32xf32>
    %185 = vector.shape_cast %182 : vector<16x32xf32> to vector<2x8x32xf32>
    %186 = vector.shape_cast %183 : vector<16x32xf32> to vector<2x8x32xf32>
    %187 = vector.extract_strided_slice %184 {offsets = [0, 0, 0], sizes = [2, 8, 8], strides = [1, 1, 1]} : vector<2x8x32xf32> to vector<2x8x8xf32>
    %cst_50 = arith.constant 0.353553385 : f32
    %188 = vector.broadcast %cst_50 : f32 to vector<2x8x8xf32>
    %189 = arith.mulf %187, %188 : vector<2x8x8xf32>
    %190 = arith.truncf %189 : vector<2x8x8xf32> to vector<2x8x8xbf16>
    %191 = vector.extract_strided_slice %185 {offsets = [0, 0, 0], sizes = [2, 8, 8], strides = [1, 1, 1]} : vector<2x8x32xf32> to vector<2x8x8xf32>
    %192 = arith.truncf %191 : vector<2x8x8xf32> to vector<2x8x8xbf16>
    %193 = vector.extract_strided_slice %186 {offsets = [0, 0, 0], sizes = [2, 8, 8], strides = [1, 1, 1]} : vector<2x8x32xf32> to vector<2x8x8xf32>
    %194 = arith.truncf %193 : vector<2x8x8xf32> to vector<2x8x8xbf16>
    "tpu.trace_start"() <{level = 10 : i32, message = "bqd,bkd->bqk"}> : () -> ()
    %cst_51 = arith.constant dense<0.000000e+00> : vector<2x8x8xf32>
    %195 = tpu.matmul %190, %192, %cst_51 {dimension_numbers = #tpu.dot_dimension_numbers<[2], [2], [1], [1], [0, 0, 0, 1, 1, 1], [0], [0]>} : vector<2x8x8xbf16>, vector<2x8x8xbf16>, vector<2x8x8xf32> -> vector<2x8x8xf32>
    "tpu.trace_stop"() : () -> ()
    %cst_52 = arith.constant dense<0xFF800000> : vector<2x8xf32>
    %196 = vector.multi_reduction <maximumf>, %195, %cst_52 [2] : vector<2x8x8xf32> to vector<2x8xf32>
    %197 = vector.shape_cast %196 : vector<2x8xf32> to vector<2x8x1xf32>
    %198 = vector.broadcast %197 : vector<2x8x1xf32> to vector<2x8x8xf32>
    %199 = arith.subf %195, %198 : vector<2x8x8xf32>
    %200 = math.exp %199 : vector<2x8x8xf32>
    %cst_53 = arith.constant dense<0.000000e+00> : vector<2x8xf32>
    %201 = vector.multi_reduction <add>, %200, %cst_53 [2] : vector<2x8x8xf32> to vector<2x8xf32>
    %202 = vector.shape_cast %201 : vector<2x8xf32> to vector<2x8x1xf32>
    %203 = tpu.reciprocal %202 : vector<2x8x1xf32> -> vector<2x8x1xf32>
    %204 = vector.broadcast %203 : vector<2x8x1xf32> to vector<2x8x8xf32>
    %205 = arith.mulf %200, %204 : vector<2x8x8xf32>
    %206 = arith.truncf %205 : vector<2x8x8xf32> to vector<2x8x8xbf16>
    "tpu.trace_start"() <{level = 10 : i32, message = "bqk,bkd->bqd"}> : () -> ()
    %cst_54 = arith.constant dense<0.000000e+00> : vector<2x8x8xf32>
    %207 = tpu.matmul %206, %194, %cst_54 {dimension_numbers = #tpu.dot_dimension_numbers<[2], [1], [1], [2], [0, 0, 0, 1, 1, 2], [0], [0]>} : vector<2x8x8xbf16>, vector<2x8x8xbf16>, vector<2x8x8xf32> -> vector<2x8x8xf32>
    "tpu.trace_stop"() : () -> ()
    %208 = vector.shape_cast %207 : vector<2x8x8xf32> to vector<16x8xf32>
    %209 = arith.truncf %208 : vector<16x8xf32> to vector<16x8xbf16>
    %210 = vector.extract_strided_slice %16 {offsets = [0, 0], sizes = [8, 32], strides = [1, 1]} : vector<32x32xbf16> to vector<8x32xbf16>
    %cst_55 = arith.constant dense<0.000000e+00> : vector<16x32xf32>
    %211 = tpu.matmul %209, %210, %cst_55 {dimension_numbers = #tpu.dot_dimension_numbers<[1], [0], [0], [1], [0, 0, 1, 1], [], []>} : vector<16x8xbf16>, vector<8x32xbf16>, vector<16x32xf32> -> vector<16x32xf32>
    %212 = vector.extract_strided_slice %184 {offsets = [0, 0, 8], sizes = [2, 8, 8], strides = [1, 1, 1]} : vector<2x8x32xf32> to vector<2x8x8xf32>
    %cst_56 = arith.constant 0.353553385 : f32
    %213 = vector.broadcast %cst_56 : f32 to vector<2x8x8xf32>
    %214 = arith.mulf %212, %213 : vector<2x8x8xf32>
    %215 = arith.truncf %214 : vector<2x8x8xf32> to vector<2x8x8xbf16>
    %216 = vector.extract_strided_slice %185 {offsets = [0, 0, 8], sizes = [2, 8, 8], strides = [1, 1, 1]} : vector<2x8x32xf32> to vector<2x8x8xf32>
    %217 = arith.truncf %216 : vector<2x8x8xf32> to vector<2x8x8xbf16>
    %218 = vector.extract_strided_slice %186 {offsets = [0, 0, 8], sizes = [2, 8, 8], strides = [1, 1, 1]} : vector<2x8x32xf32> to vector<2x8x8xf32>
    %219 = arith.truncf %218 : vector<2x8x8xf32> to vector<2x8x8xbf16>
    "tpu.trace_start"() <{level = 10 : i32, message = "bqd,bkd->bqk"}> : () -> ()
    %cst_57 = arith.constant dense<0.000000e+00> : vector<2x8x8xf32>
    %220 = tpu.matmul %215, %217, %cst_57 {dimension_numbers = #tpu.dot_dimension_numbers<[2], [2], [1], [1], [0, 0, 0, 1, 1, 1], [0], [0]>} : vector<2x8x8xbf16>, vector<2x8x8xbf16>, vector<2x8x8xf32> -> vector<2x8x8xf32>
    "tpu.trace_stop"() : () -> ()
    %cst_58 = arith.constant dense<0xFF800000> : vector<2x8xf32>
    %221 = vector.multi_reduction <maximumf>, %220, %cst_58 [2] : vector<2x8x8xf32> to vector<2x8xf32>
    %222 = vector.shape_cast %221 : vector<2x8xf32> to vector<2x8x1xf32>
    %223 = vector.broadcast %222 : vector<2x8x1xf32> to vector<2x8x8xf32>
    %224 = arith.subf %220, %223 : vector<2x8x8xf32>
    %225 = math.exp %224 : vector<2x8x8xf32>
    %cst_59 = arith.constant dense<0.000000e+00> : vector<2x8xf32>
    %226 = vector.multi_reduction <add>, %225, %cst_59 [2] : vector<2x8x8xf32> to vector<2x8xf32>
    %227 = vector.shape_cast %226 : vector<2x8xf32> to vector<2x8x1xf32>
    %228 = tpu.reciprocal %227 : vector<2x8x1xf32> -> vector<2x8x1xf32>
    %229 = vector.broadcast %228 : vector<2x8x1xf32> to vector<2x8x8xf32>
    %230 = arith.mulf %225, %229 : vector<2x8x8xf32>
    %231 = arith.truncf %230 : vector<2x8x8xf32> to vector<2x8x8xbf16>
    "tpu.trace_start"() <{level = 10 : i32, message = "bqk,bkd->bqd"}> : () -> ()
    %cst_60 = arith.constant dense<0.000000e+00> : vector<2x8x8xf32>
    %232 = tpu.matmul %231, %219, %cst_60 {dimension_numbers = #tpu.dot_dimension_numbers<[2], [1], [1], [2], [0, 0, 0, 1, 1, 2], [0], [0]>} : vector<2x8x8xbf16>, vector<2x8x8xbf16>, vector<2x8x8xf32> -> vector<2x8x8xf32>
    "tpu.trace_stop"() : () -> ()
    %233 = vector.shape_cast %232 : vector<2x8x8xf32> to vector<16x8xf32>
    %234 = arith.truncf %233 : vector<16x8xf32> to vector<16x8xbf16>
    %235 = vector.extract_strided_slice %16 {offsets = [8, 0], sizes = [8, 32], strides = [1, 1]} : vector<32x32xbf16> to vector<8x32xbf16>
    %cst_61 = arith.constant dense<0.000000e+00> : vector<16x32xf32>
    %236 = tpu.matmul %234, %235, %cst_61 {dimension_numbers = #tpu.dot_dimension_numbers<[1], [0], [0], [1], [0, 0, 1, 1], [], []>} : vector<16x8xbf16>, vector<8x32xbf16>, vector<16x32xf32> -> vector<16x32xf32>
    %237 = arith.addf %211, %236 : vector<16x32xf32>
    %238 = vector.extract_strided_slice %184 {offsets = [0, 0, 16], sizes = [2, 8, 8], strides = [1, 1, 1]} : vector<2x8x32xf32> to vector<2x8x8xf32>
    %cst_62 = arith.constant 0.353553385 : f32
    %239 = vector.broadcast %cst_62 : f32 to vector<2x8x8xf32>
    %240 = arith.mulf %238, %239 : vector<2x8x8xf32>
    %241 = arith.truncf %240 : vector<2x8x8xf32> to vector<2x8x8xbf16>
    %242 = vector.extract_strided_slice %185 {offsets = [0, 0, 16], sizes = [2, 8, 8], strides = [1, 1, 1]} : vector<2x8x32xf32> to vector<2x8x8xf32>
    %243 = arith.truncf %242 : vector<2x8x8xf32> to vector<2x8x8xbf16>
    %244 = vector.extract_strided_slice %186 {offsets = [0, 0, 16], sizes = [2, 8, 8], strides = [1, 1, 1]} : vector<2x8x32xf32> to vector<2x8x8xf32>
    %245 = arith.truncf %244 : vector<2x8x8xf32> to vector<2x8x8xbf16>
    "tpu.trace_start"() <{level = 10 : i32, message = "bqd,bkd->bqk"}> : () -> ()
    %cst_63 = arith.constant dense<0.000000e+00> : vector<2x8x8xf32>
    %246 = tpu.matmul %241, %243, %cst_63 {dimension_numbers = #tpu.dot_dimension_numbers<[2], [2], [1], [1], [0, 0, 0, 1, 1, 1], [0], [0]>} : vector<2x8x8xbf16>, vector<2x8x8xbf16>, vector<2x8x8xf32> -> vector<2x8x8xf32>
    "tpu.trace_stop"() : () -> ()
    %cst_64 = arith.constant dense<0xFF800000> : vector<2x8xf32>
    %247 = vector.multi_reduction <maximumf>, %246, %cst_64 [2] : vector<2x8x8xf32> to vector<2x8xf32>
    %248 = vector.shape_cast %247 : vector<2x8xf32> to vector<2x8x1xf32>
    %249 = vector.broadcast %248 : vector<2x8x1xf32> to vector<2x8x8xf32>
    %250 = arith.subf %246, %249 : vector<2x8x8xf32>
    %251 = math.exp %250 : vector<2x8x8xf32>
    %cst_65 = arith.constant dense<0.000000e+00> : vector<2x8xf32>
    %252 = vector.multi_reduction <add>, %251, %cst_65 [2] : vector<2x8x8xf32> to vector<2x8xf32>
    %253 = vector.shape_cast %252 : vector<2x8xf32> to vector<2x8x1xf32>
    %254 = tpu.reciprocal %253 : vector<2x8x1xf32> -> vector<2x8x1xf32>
    %255 = vector.broadcast %254 : vector<2x8x1xf32> to vector<2x8x8xf32>
    %256 = arith.mulf %251, %255 : vector<2x8x8xf32>
    %257 = arith.truncf %256 : vector<2x8x8xf32> to vector<2x8x8xbf16>
    "tpu.trace_start"() <{level = 10 : i32, message = "bqk,bkd->bqd"}> : () -> ()
    %cst_66 = arith.constant dense<0.000000e+00> : vector<2x8x8xf32>
    %258 = tpu.matmul %257, %245, %cst_66 {dimension_numbers = #tpu.dot_dimension_numbers<[2], [1], [1], [2], [0, 0, 0, 1, 1, 2], [0], [0]>} : vector<2x8x8xbf16>, vector<2x8x8xbf16>, vector<2x8x8xf32> -> vector<2x8x8xf32>
    "tpu.trace_stop"() : () -> ()
    %259 = vector.shape_cast %258 : vector<2x8x8xf32> to vector<16x8xf32>
    %260 = arith.truncf %259 : vector<16x8xf32> to vector<16x8xbf16>
    %261 = vector.extract_strided_slice %16 {offsets = [16, 0], sizes = [8, 32], strides = [1, 1]} : vector<32x32xbf16> to vector<8x32xbf16>
    %cst_67 = arith.constant dense<0.000000e+00> : vector<16x32xf32>
    %262 = tpu.matmul %260, %261, %cst_67 {dimension_numbers = #tpu.dot_dimension_numbers<[1], [0], [0], [1], [0, 0, 1, 1], [], []>} : vector<16x8xbf16>, vector<8x32xbf16>, vector<16x32xf32> -> vector<16x32xf32>
    %263 = arith.addf %237, %262 : vector<16x32xf32>
    %264 = vector.extract_strided_slice %184 {offsets = [0, 0, 24], sizes = [2, 8, 8], strides = [1, 1, 1]} : vector<2x8x32xf32> to vector<2x8x8xf32>
    %cst_68 = arith.constant 0.353553385 : f32
    %265 = vector.broadcast %cst_68 : f32 to vector<2x8x8xf32>
    %266 = arith.mulf %264, %265 : vector<2x8x8xf32>
    %267 = arith.truncf %266 : vector<2x8x8xf32> to vector<2x8x8xbf16>
    %268 = vector.extract_strided_slice %185 {offsets = [0, 0, 24], sizes = [2, 8, 8], strides = [1, 1, 1]} : vector<2x8x32xf32> to vector<2x8x8xf32>
    %269 = arith.truncf %268 : vector<2x8x8xf32> to vector<2x8x8xbf16>
    %270 = vector.extract_strided_slice %186 {offsets = [0, 0, 24], sizes = [2, 8, 8], strides = [1, 1, 1]} : vector<2x8x32xf32> to vector<2x8x8xf32>
    %271 = arith.truncf %270 : vector<2x8x8xf32> to vector<2x8x8xbf16>
    "tpu.trace_start"() <{level = 10 : i32, message = "bqd,bkd->bqk"}> : () -> ()
    %cst_69 = arith.constant dense<0.000000e+00> : vector<2x8x8xf32>
    %272 = tpu.matmul %267, %269, %cst_69 {dimension_numbers = #tpu.dot_dimension_numbers<[2], [2], [1], [1], [0, 0, 0, 1, 1, 1], [0], [0]>} : vector<2x8x8xbf16>, vector<2x8x8xbf16>, vector<2x8x8xf32> -> vector<2x8x8xf32>
    "tpu.trace_stop"() : () -> ()
    %cst_70 = arith.constant dense<0xFF800000> : vector<2x8xf32>
    %273 = vector.multi_reduction <maximumf>, %272, %cst_70 [2] : vector<2x8x8xf32> to vector<2x8xf32>
    %274 = vector.shape_cast %273 : vector<2x8xf32> to vector<2x8x1xf32>
    %275 = vector.broadcast %274 : vector<2x8x1xf32> to vector<2x8x8xf32>
    %276 = arith.subf %272, %275 : vector<2x8x8xf32>
    %277 = math.exp %276 : vector<2x8x8xf32>
    %cst_71 = arith.constant dense<0.000000e+00> : vector<2x8xf32>
    %278 = vector.multi_reduction <add>, %277, %cst_71 [2] : vector<2x8x8xf32> to vector<2x8xf32>
    %279 = vector.shape_cast %278 : vector<2x8xf32> to vector<2x8x1xf32>
    %280 = tpu.reciprocal %279 : vector<2x8x1xf32> -> vector<2x8x1xf32>
    %281 = vector.broadcast %280 : vector<2x8x1xf32> to vector<2x8x8xf32>
    %282 = arith.mulf %277, %281 : vector<2x8x8xf32>
    %283 = arith.truncf %282 : vector<2x8x8xf32> to vector<2x8x8xbf16>
    "tpu.trace_start"() <{level = 10 : i32, message = "bqk,bkd->bqd"}> : () -> ()
    %cst_72 = arith.constant dense<0.000000e+00> : vector<2x8x8xf32>
    %284 = tpu.matmul %283, %271, %cst_72 {dimension_numbers = #tpu.dot_dimension_numbers<[2], [1], [1], [2], [0, 0, 0, 1, 1, 2], [0], [0]>} : vector<2x8x8xbf16>, vector<2x8x8xbf16>, vector<2x8x8xf32> -> vector<2x8x8xf32>
    "tpu.trace_stop"() : () -> ()
    %285 = vector.shape_cast %284 : vector<2x8x8xf32> to vector<16x8xf32>
    %286 = arith.truncf %285 : vector<16x8xf32> to vector<16x8xbf16>
    %287 = vector.extract_strided_slice %16 {offsets = [24, 0], sizes = [8, 32], strides = [1, 1]} : vector<32x32xbf16> to vector<8x32xbf16>
    %cst_73 = arith.constant dense<0.000000e+00> : vector<16x32xf32>
    %288 = tpu.matmul %286, %287, %cst_73 {dimension_numbers = #tpu.dot_dimension_numbers<[1], [0], [0], [1], [0, 0, 1, 1], [], []>} : vector<16x8xbf16>, vector<8x32xbf16>, vector<16x32xf32> -> vector<16x32xf32>
    %289 = arith.addf %263, %288 : vector<16x32xf32>
    %290 = vector.broadcast %21 : vector<1x32xf32> to vector<16x32xf32>
    %291 = arith.addf %289, %290 : vector<16x32xf32>
    %292 = arith.addf %169, %291 : vector<16x32xf32>
    %cst_74 = arith.constant dense<0.000000e+00> : vector<16xf32>
    %293 = vector.multi_reduction <add>, %292, %cst_74 [1] : vector<16x32xf32> to vector<16xf32>
    %294 = vector.shape_cast %293 : vector<16xf32> to vector<16x1xf32>
    %cst_75 = arith.constant 3.200000e+01 : f32
    %295 = vector.broadcast %cst_75 : f32 to vector<16x1xf32>
    %296 = arith.divf %294, %295 : vector<16x1xf32>
    %297 = vector.broadcast %296 : vector<16x1xf32> to vector<16x32xf32>
    %298 = arith.subf %292, %297 : vector<16x32xf32>
    %299 = arith.mulf %298, %298 : vector<16x32xf32>
    %cst_76 = arith.constant dense<0.000000e+00> : vector<16xf32>
    %300 = vector.multi_reduction <add>, %299, %cst_76 [1] : vector<16x32xf32> to vector<16xf32>
    %301 = vector.shape_cast %300 : vector<16xf32> to vector<16x1xf32>
    %cst_77 = arith.constant 3.200000e+01 : f32
    %302 = vector.broadcast %cst_77 : f32 to vector<16x1xf32>
    %303 = arith.divf %301, %302 : vector<16x1xf32>
    %cst_78 = arith.constant 9.99999974E-6 : f32
    %304 = vector.broadcast %cst_78 : f32 to vector<16x1xf32>
    %305 = arith.addf %303, %304 : vector<16x1xf32>
    %306 = math.rsqrt %305 : vector<16x1xf32>
    %307 = vector.broadcast %306 : vector<16x1xf32> to vector<16x32xf32>
    %308 = arith.mulf %298, %307 : vector<16x32xf32>
    %309 = vector.broadcast %25 : vector<1x32xf32> to vector<16x32xf32>
    %310 = arith.mulf %308, %309 : vector<16x32xf32>
    %311 = vector.broadcast %26 : vector<1x32xf32> to vector<16x32xf32>
    %312 = arith.addf %310, %311 : vector<16x32xf32>
    %313 = arith.truncf %312 : vector<16x32xf32> to vector<16x32xbf16>
    %cst_79 = arith.constant dense<0.000000e+00> : vector<16x32xf32>
    %314 = tpu.matmul %313, %17, %cst_79 {dimension_numbers = #tpu.dot_dimension_numbers<[1], [0], [0], [1], [0, 0, 1, 1], [], []>} : vector<16x32xbf16>, vector<32x32xbf16>, vector<16x32xf32> -> vector<16x32xf32>
    %315 = vector.broadcast %22 : vector<1x32xf32> to vector<16x32xf32>
    %316 = arith.addf %314, %315 : vector<16x32xf32>
    %317 = arith.addf %312, %316 : vector<16x32xf32>
    %cst_80 = arith.constant dense<0.000000e+00> : vector<16xf32>
    %318 = vector.multi_reduction <add>, %317, %cst_80 [1] : vector<16x32xf32> to vector<16xf32>
    %319 = vector.shape_cast %318 : vector<16xf32> to vector<16x1xf32>
    %cst_81 = arith.constant 3.200000e+01 : f32
    %320 = vector.broadcast %cst_81 : f32 to vector<16x1xf32>
    %321 = arith.divf %319, %320 : vector<16x1xf32>
    %322 = vector.broadcast %321 : vector<16x1xf32> to vector<16x32xf32>
    %323 = arith.subf %317, %322 : vector<16x32xf32>
    %324 = arith.mulf %323, %323 : vector<16x32xf32>
    %cst_82 = arith.constant dense<0.000000e+00> : vector<16xf32>
    %325 = vector.multi_reduction <add>, %324, %cst_82 [1] : vector<16x32xf32> to vector<16xf32>
    %326 = vector.shape_cast %325 : vector<16xf32> to vector<16x1xf32>
    %cst_83 = arith.constant 3.200000e+01 : f32
    %327 = vector.broadcast %cst_83 : f32 to vector<16x1xf32>
    %328 = arith.divf %326, %327 : vector<16x1xf32>
    %cst_84 = arith.constant 9.99999974E-6 : f32
    %329 = vector.broadcast %cst_84 : f32 to vector<16x1xf32>
    %330 = arith.addf %328, %329 : vector<16x1xf32>
    %331 = math.rsqrt %330 : vector<16x1xf32>
    %332 = vector.broadcast %331 : vector<16x1xf32> to vector<16x32xf32>
    %333 = arith.mulf %323, %332 : vector<16x32xf32>
    %334 = vector.broadcast %27 : vector<1x32xf32> to vector<16x32xf32>
    %335 = arith.mulf %333, %334 : vector<16x32xf32>
    %336 = vector.broadcast %28 : vector<1x32xf32> to vector<16x32xf32>
    %337 = arith.addf %335, %336 : vector<16x32xf32>
    %c0_85 = arith.constant 0 : index
    %c0_86 = arith.constant 0 : index
    %338 = vector.load %arg10[%c0_85, %c0_86] : memref<16x32xf32, #tpu.memory_space<vmem>>, vector<16x32xf32>
    tpu.vector_store %arg10[%c0_85, %c0_86], %337 {strides = array<i32>} : memref<16x32xf32, #tpu.memory_space<vmem>>, vector<16x32xf32>,
    return
  }
  func.func @transform_0(%arg0: i32, %arg1: i32) -> (i32, i32) {
    %c0_i32 = arith.constant 0 : i32
    %c0_i32_0 = arith.constant 0 : i32
    return %arg0, %c0_i32 : i32, i32
  }
  func.func @transform_1(%arg0: i32, %arg1: i32) -> (i32, i32) {
    %c0_i32 = arith.constant 0 : i32
    %c0_i32_0 = arith.constant 0 : i32
    return %arg0, %c0_i32 : i32, i32
  }
  func.func @transform_2(%arg0: i32, %arg1: i32) -> (i32, i32) {
    %c0_i32 = arith.constant 0 : i32
    %c0_i32_0 = arith.constant 0 : i32
    %c0_i32_1 = arith.constant 0 : i32
    return %c0_i32, %c0_i32_0 : i32, i32
  }
  func.func @transform_3(%arg0: i32, %arg1: i32) -> (i32, i32, i32) {
    %c0_i32 = arith.constant 0 : i32
    %c0_i32_0 = arith.constant 0 : i32
    %c0_i32_1 = arith.constant 0 : i32
    return %arg0, %c0_i32, %c0_i32_0 : i32, i32, i32
  }
  func.func @transform_4(%arg0: i32, %arg1: i32) -> (i32, i32, i32) {
    %c0_i32 = arith.constant 0 : i32
    %c0_i32_0 = arith.constant 0 : i32
    %c0_i32_1 = arith.constant 0 : i32
    return %arg1, %c0_i32, %c0_i32_0 : i32, i32, i32
  }
  func.func @transform_5(%arg0: i32, %arg1: i32) -> (i32, i32, i32) {
    %c0_i32 = arith.constant 0 : i32
    %c0_i32_0 = arith.constant 0 : i32
    %c0_i32_1 = arith.constant 0 : i32
    return %arg1, %c0_i32, %c0_i32_0 : i32, i32, i32
  }
  func.func @transform_6(%arg0: i32, %arg1: i32) -> (i32, i32, i32) {
    %c0_i32 = arith.constant 0 : i32
    %c0_i32_0 = arith.constant 0 : i32
    %c0_i32_1 = arith.constant 0 : i32
    return %arg1, %c0_i32, %c0_i32_0 : i32, i32, i32
  }
  func.func @transform_7(%arg0: i32, %arg1: i32) -> (i32, i32, i32) {
    %c0_i32 = arith.constant 0 : i32
    %c0_i32_0 = arith.constant 0 : i32
    %c0_i32_1 = arith.constant 0 : i32
    return %arg1, %c0_i32, %c0_i32_0 : i32, i32, i32
  }
  func.func @transform_8(%arg0: i32, %arg1: i32) -> (i32, i32) {
    %c0_i32 = arith.constant 0 : i32
    %c0_i32_0 = arith.constant 0 : i32
    return %arg0, %c0_i32 : i32, i32
  }
}

</mosaic_0001>

<bundles_post_ra>
// kernel: decoder_forward.1
= control target key start
LH: loop header
LB: loop body
LE: loop exit
PB: predicated region body
PF: predicated region fallthrough
CT: control target
= control target key end

     0   :  { %13 = vsyncpa [#allocation4], 0  ;;  %s3847_s27 = smov 0   ;;  %s3849_s28 = smov 0   ;;  %s4423_s0 = inlined_call_operand.vmem [shape: f32[16,32], index: 0, kind: input, shape index: {}]   ;;  %s4424_s1 = inlined_call_operand.vmem [shape: f32[16,32], index: 1, kind: input, shape index: {}]   ;;  %s4425_s2 = inlined_call_operand.vmem [shape: f32[8,8], index: 2, kind: input, shape index: {}]   ;;  %s4426_s3 = inlined_call_operand.vmem [shape: f32[2,1,8], index: 3, kind: input, shape index: {}]   ;;  %s4427_s4 = inlined_call_operand.vmem [shape: bf16[2,64,96], index: 4, kind: input, shape index: {}]   ;;  %s4428_s5 = inlined_call_operand.vmem [shape: f32[2,2,96], index: 5, kind: input, shape index: {}]   ;;  %s4429_s6 = inlined_call_operand.vmem [shape: bf16[2,96,32], index: 6, kind: input, shape index: {}]   ;;  %s4430_s7 = inlined_call_operand.vmem [shape: f32[2,9,32], index: 7, kind: input, shape index: {}]   ;;  %s4431_s8 = inlined_call_operand.hbm [shape: f32[16,32], index: 8, kind: output, shape index: {}]  }
   0x1   :  { %s3851_s29 = smov 0  }
   0x2 LB: > { %s3165_s30 = sadd.s32 4294967295, %s3784_s29   ;;  %s28_s9 = sadd.s32 1, %s3780_s28  ;;  %s3784_s29 = sphi %s3851_s29, %s19_s29   ;;  %s3780_s28 = sphi %s3849_s28, %s4434_s28   ;;  %s3776_s27 = sphi %s3847_s27, %s4433_s27  }
   0x3   : > { %p29_p0 = scmp.ge.s32.totalorder %s28_s9, 2  ;;  %p3171_p1 = scmp.ge.s32.totalorder %s3784_s29, 1 }
   0x4   : > { %p336_p2 = scmp.lt.s32.totalorder %s3784_s29, 3 }
   0x5   : > { %s4436_s9 = smov (%p29_p0, %s28_s9), 0 }
   0x6   : > { %p337_p3 = pnand %p3171_p1, %p336_p2 }
   0x7   : > { %p410_p4 = scmp.lt.s32.totalorder (!%p337_p3), %s3776_s27, 1  ;;  %p3178_p5 = scmp.ne.s32.totalorder (!%p337_p3), %s3776_s27, 0 }
   0x8   : > { %340 = sbr.rel (%p337_p3) target bundleno = 7776 (0x1e60), region = 52 }
   0xf   : > { %s411_s10 = scalar_select %p410_p4, %s3776_s27, 1 }
  0x10   : > { %434 = sbr.rel (%p3178_p5) target bundleno = 23 (0x17), region = 56  ;;  %v435_v0 = vld [vmem:[%s4423_s0] sm:$0xff] (!%p3178_p5)  ;;  %vm437_vm0 = vcmask (!%p3178_p5), 261120   ;;  %v436_v1 = vld [vmem:[%s4423_s0 + $0x8] sm:$0xff] (!%p3178_p5)  ;;  %vm457_vm1 = vcmask (!%p3178_p5), 64512  }
  0x11   : > { %s3236_s11 = sshll.u32 %s411_s10, 5  ;;  %s3174_s12 = sshll.u32 %s411_s10, 1  ;;  %v440_v2 = vld [vmem:[%s4425_s2] sm:$0xff] (!%p3178_p5)  ;;  %438 = vst.msk [vmem:[#allocation3] sm:$0xff] (!%p3178_p5), %vm437_vm0, %v435_v0  ;;  %439 = vst.msk [vmem:[#allocation3 + $0x8] sm:$0xff] (!%p3178_p5), %vm437_vm0, %v436_v1 }
  0x12   : > { %s3869_s15 = scalar_lea.vmem %s4427_s4, %s3236_s11  ;;  %s3874_s18 = scalar_lea.vmem %s4428_s5, %s3174_s12  ;;  %v3179_v3 = vld [vmem:[%s4426_s3] ss:$0 sm:$0xff] (!%p3178_p5)  ;;  %v3180_v4 = vld [vmem:[%s4426_s3 + $0x1] ss:$0 sm:$0xff] (!%p3178_p5) }
  0x13   : > { %s3602_s19 = smul.u32 48, %s411_s10  ;;  %s3237_s20 = sshll.u32 %s411_s10, 4  ;;  %v455_v5 = vadd.f32 (!%p3178_p5), %v3179_v3, %v440_v2  ;;  %v456_v6 = vadd.f32 (!%p3178_p5), %v3180_v4, %v440_v2 }
  0x14   : > { %s3879_s23 = scalar_lea.vmem %s4430_s7, %s3237_s20 }
  0x15   : > { %s3884_s26 = scalar_lea.vmem %s4429_s6, %s3602_s19  ;;  %458 = vst.msk [vmem:[#allocation2] sm:$0xff] (!%p3178_p5), %vm457_vm1, %v455_v5  ;;  %459 = vst.msk [vmem:[#allocation2 + $0x8] sm:$0xff] (!%p3178_p5), %vm457_vm1, %v456_v6 }
  0x17 PF: > { %v3649_v7 = vld [vmem:[%s3869_s15] sm:$0xff]   ;;  %v3786_v8 = vmov 0.0   ;;  %v3650_v9 = vld [vmem:[%s3869_s15 + $0x8] sm:$0xff]   ;;  %vm3787_vm2 = vmmov 0   ;;  %vm504_vm3 = vcmask 261120   ;;  %v488_v13 = vlaneseq  ;;  %s3788_s21 = smov 96  }
  0x18   : > { %3330 = vmatprep.subr.bf16.mxu0 %v3786_v8  ;;  %3338 = vmatprep.subr.bf16.mxu1 %v3786_v8  ;;  %v3907_v10 = vld [vmem:[#allocation3] sm:$0xff]  ;;  %v3909_v11 = vld [vmem:[#allocation3 + $0x8] sm:$0xff]  ;;  %v3924_v16 = vld [vmem:[%s3874_s18] sm:$0x3]  ;;  %vm560_vm4 = vcmask 64512   ;;  %s3789_s18 = smov 64  }
  0x19   : > { %3331 = vmatpush3.bf16.msra.mxu0 %v3649_v7  ;;  %3334 = vmatprep.mubr.msk.bf16.mxu0 %vm3787_vm2, %v3786_v8  ;;  %v487_v12 = vpack.c.bf16 %v3909_v11, %v3907_v10  ;;  %v3920_v14 = vshrl.u32 %v488_v13, 7  ;;  %s3790_s22 = smov 88   ;;  %vm685_vm5 = vcmask 1043456   ;;  %s3791_s24 = smov 120  }
  0x1a   : > { %3332 = vmatprep.subr.bf16.mxu0 %v3786_v8  ;;  %3340 = vmatprep.mubr.msk.bf16.mxu1 %vm3787_vm2, %v3786_v8  ;;  %s3792_s25 = smov 56   ;;  %s3793_s11 = smov 112  }
  0x1b   : > { %v490_v15 = vsub.s32 0, %v3920_v14  ;;  %s3794_s13 = smov 80   ;;  %s3795_s12 = smov 48  }
  0x1c   : > { %v3953_v34 = vld [vmem:[#allocation2] sm:$0xff]  ;;  %v3956_v39 = vld [vmem:[#allocation2 + $0x8] sm:$0xff]  ;;  %s3796_s14 = smov 72   ;;  %s3797_s10 = smov 104  }
  0x1d   : > { %3333 = vmatpush3.bf16.msra.mxu0 %v3650_v9  ;;  %v491_v17 = vrot.slane %v3924_v16, %v490_v15  ;;  %s3798_s16 = smov 40   ;;  %p4386_p6 = scmp.eq.s32.totalorder %s3165_s30, 1 }
  0x1e   : > { %3344 = vmatprep.subr.bf16.mxu0 %v3786_v8 }
  0x20   : > { %3335 = vmatmul.mubr.msk.bf16.vlgmr.msra.gmra.mrb[0].mxu0 %vm504_vm3, %v487_v12 }
  0x21   : > { %3346 = vmatprep.mubr.msk.bf16.mxu0 %vm3787_vm2, %v3786_v8 }
  0xf3   : > { %v542_v18 = vpop.f32.mrb[0].mxu0 }
  0xf4   : > { %v543_v19 = vadd.f32 %v542_v18, %v491_v17  ;;  %v3336_v20 = vpop.f32.mrb[1].mxu0 }
  0xf5   : > { %v545_v21 = vpop.f32.mrb[2].mxu0 }
  0xf6   : > { %v3929_v22 = vpack.c.bf16 %v543_v19, %v543_v19  ;;  %v546_v23 = vadd.f32 %v545_v21, %v491_v17  ;;  %v3337_v24 = vpop.f32.mrb[3].mxu0  ;;  %v551_v28 = vmul.f32 0.35355338, %v543_v19 }
  0xf8   : > { %558 = vrot.lane.b32.xlu0 %v3929_v22, %s3788_s21  ;;  %v3933_v25 = vpack.c.bf16 %v546_v23, %v546_v23  ;;  %v3940_v31 = vpack.c.bf16 %v551_v28, %v551_v28  ;;  %v552_v32 = vmul.f32 0.35355338, %v546_v23 }
  0xfa   : > { %v3947_v33 = vpack.c.bf16 %v552_v32, %v552_v32 }
  0xfc   : > { %608 = vrot.lane.b32.xlu0 %v3933_v25, %s3788_s21 }
 0x16a   : > { %v559_v26 = vpop.permute.xlu0 %558 }
 0x16b   : > { %v565_v27 = vsel %vm560_vm4, %v559_v26, 0 }
 0x16c   : > { %3339 = vmatpush3.bf16.xpose.msra.mxu1 %v565_v27 }
 0x16d   : > { %3350 = vmatprep.subr.bf16.mxu1 %v3786_v8 }
 0x16e   : > { %v609_v29 = vpop.permute.xlu0 %608 }
 0x16f   : > { %v614_v30 = vsel %vm560_vm4, %v609_v29, 0 }
 0x170   : > { %3345 = vmatpush3.bf16.xpose.msra.mxu0 %v614_v30 }
 0x171   : > { %3356 = vmatprep.subr.bf16.mxu0 %v3786_v8 }
 0x173   : > { %3341 = vmatmul.mubr.msk.bf16.vlgmr.msra.gmra.mrb[0].mxu1 %vm560_vm4, %v3940_v31 }
 0x174   : > { %3352 = vmatprep.mubr.msk.bf16.mxu1 %vm3787_vm2, %v3786_v8 }
 0x177   : > { %3347 = vmatmul.mubr.msk.bf16.vlgmr.msra.gmra.mrb[4].mxu0 %vm560_vm4, %v3947_v33 }
 0x178   : > { %3358 = vmatprep.mubr.msk.bf16.mxu0 %vm3787_vm2, %v3786_v8 }
 0x246   : > { %v601_v35 = vpop.f32.mrb[0].mxu1 }
 0x247   : > { %v602_v36 = vadd.f32 %v601_v35, %v3953_v34  ;;  %v3342_v37 = vpop.f32.mrb[1].mxu1 }
 0x248   : > { %v604_v38 = vpop.f32.mrb[2].mxu1 }
 0x249   : > { %v3343_v40 = vpop.f32.mrb[3].mxu1  ;;  %v656_v41 = vsel %vm560_vm4, %v602_v36, -inf }
 0x24a   : > { %657 = vmax.xlane.f32.xlu1 %v656_v41  ;;  %v650_v42 = vpop.f32.mrb[4].mxu0 }
 0x24b   : > { %v651_v43 = vadd.f32 %v650_v42, %v3956_v39  ;;  %v3348_v44 = vpop.f32.mrb[5].mxu0 }
 0x24c   : > { %v653_v45 = vpop.f32.mrb[6].mxu0 }
 0x24d   : > { %v3349_v46 = vpop.f32.mrb[7].mxu0  ;;  %v659_v47 = vsel %vm560_vm4, %v651_v43, -inf }
 0x24e   : > { %660 = vmax.xlane.f32.xlu1 %v659_v47 }
 0x25f   : > { %680 = vrot.lane.b32.xlu1 %v3929_v22, %s3789_s18 }
 0x263   : > { %729 = vrot.lane.b32.xlu1 %v3933_v25, %s3789_s18 }
 0x267   : > { %781 = vrot.lane.b32.xlu1 %v3929_v22, %s3790_s22 }
 0x2d7   : > { %v658_v48 = vpop.xlane.xlu1 %657 }
 0x2d8   : > { %v662_v49 = vsub.f32 %v602_v36, %v658_v48 }
 0x2da   : > { %v664_v50 = vmul.f32 1.442695, %v662_v49 }
 0x2db   : > { %v661_v51 = vpop.xlane.xlu1 %660 }
 0x2dc   : > { %3655 = vpow2.f32 %v664_v50  ;;  %v663_v52 = vsub.f32 %v651_v43, %v661_v51 }
 0x2de   : > { %v666_v53 = vmul.f32 1.442695, %v663_v52 }
 0x2df   : > { %v681_v54 = vpop.permute.xlu1 %680 }
 0x2e0   : > { %3657 = vpow2.f32 %v666_v53  ;;  %v687_v55 = vsel %vm685_vm5, %v681_v54, 0 }
 0x2e1   : > { %3351 = vmatpush3.bf16.msra.mxu1 %v687_v55 }
 0x2e2   : > { %3362 = vmatprep.subr.bf16.mxu1 %v3786_v8 }
 0x2e3   : > { %v730_v56 = vpop.permute.xlu1 %729 }
 0x2e4   : > { %v735_v57 = vsel %vm685_vm5, %v730_v56, 0 }
 0x2e5   : > { %3357 = vmatpush3.bf16.msra.mxu0 %v735_v57 }
 0x2e6   : > { %v3656_v58 = vpop.eup %3655  ;;  %3368 = vmatprep.subr.bf16.mxu0 %v3786_v8 }
 0x2e7   : > { %v668_v59 = vsel %vm560_vm4, %v3656_v58, 0.0  ;;  %v782_v62 = vpop.permute.xlu1 %781 }
 0x2e8   : > { %669 = vadd.xlane.f32.xlu0 %v668_v59  ;;  %v787_v5 = vsel %vm560_vm4, %v782_v62, 0  ;;  %v473_v62 = vld [vmem:[%s3884_s26 + $0x4] sm:$0xf] }
 0x2ea   : > { %v3658_v60 = vpop.eup %3657 }
 0x2eb   : > { %v671_v61 = vsel %vm560_vm4, %v3658_v60, 0.0 }
 0x2ec   : > { %672 = vadd.xlane.f32.xlu1 %v671_v61 }
 0x2fd   : > { %832 = vrot.lane.b32.xlu1 %v3933_v25, %s3790_s22 }
 0x2fe   : > { %779 = vrot.lane.b32.xlu0 %v3940_v31, %s3791_s24 }
 0x301   : > { %830 = vrot.lane.b32.xlu1 %v3947_v33, %s3791_s24 }
 0x375   : > { %v670_v63 = vpop.xlane.xlu0 %669 }
 0x376   : > { %3659 = vrcp.f32 %v670_v63 }
 0x379   : > { %v673_v0 = vpop.xlane.xlu1 %672  ;;  %v780_v13 = vpop.permute.xlu0 %779 }
 0x37a   : > { %3661 = vrcp.f32 %v673_v0 }
 0x37d   : > { %v833_v7 = vpop.permute.xlu1 %832 }
 0x37e   : > { %v838_v12 = vsel %vm560_vm4, %v833_v7, 0 }
 0x380   : > { %v3660_v1 = vpop.eup %3659 }
 0x381   : > { %v676_v2 = vmul.f32 %v3660_v1, %v3656_v58  ;;  %v831_v17 = vpop.permute.xlu1 %830  ;;  %v1005_v1 = vsel %vm685_vm5, %v473_v62, 0 }
 0x383   : > { %v678_v3 = vpack.c.bf16 %v676_v2, %v676_v2 }
 0x384   : > { %v3662_v4 = vpop.eup %3661 }
 0x385   : > { %v677_v6 = vmul.f32 %v3662_v4, %v3658_v60  ;;  %3353 = vmatmul.mubr.msk.bf16.vlgmr.msra.gmra.mrb[4].mxu1 %vm560_vm4, %v678_v3  ;;  %v472_v3 = vld [vmem:[%s3884_s26] sm:$0xf] }
 0x386   : > { %3363 = vmatpush3.bf16.xpose.msra.mxu1 %v787_v5  ;;  %3364 = vmatprep.mubr.msk.bf16.mxu1 %vm3787_vm2, %v3786_v8 }
 0x387   : > { %v679_v9 = vpack.c.bf16 %v677_v6, %v677_v6  ;;  %3374 = vmatprep.subr.bf16.mxu1 %v3786_v8  ;;  %v1052_v6 = vsel %vm685_vm5, %v472_v3, 0 }
 0x389   : > { %3359 = vmatmul.mubr.msk.bf16.vlgmr.msra.gmra.mrb[8].mxu0 %vm560_vm4, %v679_v9 }
 0x38a   : > { %3369 = vmatpush3.bf16.xpose.msra.mxu0 %v838_v12  ;;  %3370 = vmatprep.mubr.msk.bf16.mxu0 %vm3787_vm2, %v3786_v8 }
 0x38b   : > { %3380 = vmatprep.subr.bf16.mxu0 %v3786_v8 }
 0x38d   : > { %3365 = vmatmul.mubr.msk.bf16.vlgmr.msra.gmra.mrb[8].mxu1 %vm560_vm4, %v780_v13 }
 0x38e   : > { %3376 = vmatprep.mubr.msk.bf16.mxu1 %vm3787_vm2, %v3786_v8 }
 0x391   : > { %3371 = vmatmul.mubr.msk.bf16.vlgmr.msra.gmra.mrb[12].mxu0 %vm560_vm4, %v831_v17 }
 0x392   : > { %3382 = vmatprep.mubr.msk.bf16.mxu0 %vm3787_vm2, %v3786_v8 }
 0x458   : > { %v3993_v18 = vpop.f32.mrb[4].mxu1 }
 0x459   : > { %v3354_v19 = vpop.f32.mrb[5].mxu1 }
 0x45a   : > { %v726_v20 = vpop.f32.mrb[6].mxu1 }
 0x45b   : > { %v3355_v21 = vpop.f32.mrb[7].mxu1 }
 0x45c   : > { %v3995_v23 = vpop.f32.mrb[8].mxu0 }
 0x45d   : > { %v777_v24 = vpack.c.bf16 %v3995_v23, %v3993_v18  ;;  %v3360_v26 = vpop.f32.mrb[9].mxu0 }
 0x45e   : > { %v774_v27 = vpop.f32.mrb[10].mxu0 }
 0x45f   : > { %v3361_v28 = vpop.f32.mrb[11].mxu0 }
 0x460   : > { %v823_v29 = vpop.f32.mrb[8].mxu1 }
 0x461   : > { %v824_v30 = vadd.f32 %v823_v29, %v3953_v34  ;;  %v3366_v32 = vpop.f32.mrb[9].mxu1 }
 0x462   : > { %v826_v35 = vpop.f32.mrb[10].mxu1 }
 0x463   : > { %v3367_v36 = vpop.f32.mrb[11].mxu1  ;;  %v880_v37 = vsel %vm560_vm4, %v824_v30, -inf }
 0x464   : > { %881 = vmax.xlane.f32.xlu1 %v880_v37  ;;  %v874_v38 = vpop.f32.mrb[12].mxu0 }
 0x465   : > { %v875_v40 = vadd.f32 %v874_v38, %v3956_v39  ;;  %v3372_v41 = vpop.f32.mrb[13].mxu0 }
 0x466   : > { %v877_v42 = vpop.f32.mrb[14].mxu0 }
 0x467   : > { %v3373_v43 = vpop.f32.mrb[15].mxu0  ;;  %v883_v44 = vsel %vm560_vm4, %v875_v40, -inf }
 0x468   : > { %884 = vmax.xlane.f32.xlu0 %v883_v44 }
 0x47e   : > { %952 = vrot.lane.b32.xlu0 %v3933_v25, %s3792_s25 }
 0x482   : > { %1095 = vrot.lane.b32.xlu0 %v3940_v31, %s3793_s11 }
 0x4f1   : > { %v882_v45 = vpop.xlane.xlu1 %881 }
 0x4f2   : > { %v886_v46 = vsub.f32 %v824_v30, %v882_v45 }
 0x4f4   : > { %v888_v47 = vmul.f32 1.442695, %v886_v46 }
 0x4f5   : > { %v885_v48 = vpop.xlane.xlu0 %884 }
 0x4f6   : > { %3663 = vpow2.f32 %v888_v47  ;;  %v887_v49 = vsub.f32 %v875_v40, %v885_v48 }
 0x4f8   : > { %v890_v50 = vmul.f32 1.442695, %v887_v49 }
 0x4f9   : > { %v953_v51 = vpop.permute.xlu0 %952 }
 0x4fa   : > { %3665 = vpow2.f32 %v890_v50  ;;  %v958_v52 = vsel %vm685_vm5, %v953_v51, 0 }
 0x4fb   : > { %3381 = vmatpush3.bf16.msra.mxu0 %v958_v52 }
 0x4fc   : > { %3392 = vmatprep.subr.bf16.mxu0 %v3786_v8 }
 0x4fd   : > { %v1096_v32 = vpop.permute.xlu0 %1095 }
 0x500   : > { %v3664_v53 = vpop.eup %3663 }
 0x501   : > { %v892_v54 = vsel %vm560_vm4, %v3664_v53, 0.0 }
 0x502   : > { %893 = vadd.xlane.f32.xlu1 %v892_v54 }
 0x504   : > { %v3666_v55 = vpop.eup %3665 }
 0x505   : > { %v895_v56 = vsel %vm560_vm4, %v3666_v55, 0.0 }
 0x506   : > { %896 = vadd.xlane.f32.xlu1 %v895_v56 }
 0x517   : > { %904 = vrot.lane.b32.xlu1 %v3929_v22, %s3792_s25 }
 0x51b   : > { %1097 = vrot.lane.b32.xlu1 %v3929_v22, %s3794_s13 }
 0x51f   : > { %1147 = vrot.lane.b32.xlu1 %v3933_v25, %s3794_s13 }
 0x523   : > { %1145 = vrot.lane.b32.xlu1 %v3947_v33, %s3793_s11 }
 0x58f   : > { %v894_v57 = vpop.xlane.xlu1 %893 }
 0x590   : > { %3667 = vrcp.f32 %v894_v57 }
 0x593   : > { %v897_v58 = vpop.xlane.xlu1 %896 }
 0x594   : > { %3669 = vrcp.f32 %v897_v58 }
 0x597   : > { %v905_v59 = vpop.permute.xlu1 %904 }
 0x598   : > { %v910_v60 = vsel %vm685_vm5, %v905_v59, 0 }
 0x599   : > { %3375 = vmatpush3.bf16.msra.mxu1 %v910_v60 }
 0x59a   : > { %v3668_v61 = vpop.eup %3667  ;;  %3386 = vmatprep.subr.bf16.mxu1 %v3786_v8 }
 0x59b   : > { %v900_v63 = vmul.f32 %v3668_v61, %v3664_v53  ;;  %v1098_v7 = vpop.permute.xlu1 %1097 }
 0x59c   : > { %v1103_v27 = vsel %vm560_vm4, %v1098_v7, 0 }
 0x59d   : > { %v902_v0 = vpack.c.bf16 %v900_v63, %v900_v63 }
 0x59e   : > { %v3670_v2 = vpop.eup %3669 }
 0x59f   : > { %v901_v4 = vmul.f32 %v3670_v2, %v3666_v55  ;;  %3377 = vmatmul.mubr.msk.bf16.vlgmr.msra.gmra.mrb[12].mxu1 %vm560_vm4, %v902_v0  ;;  %v1148_v9 = vpop.permute.xlu1 %1147 }
 0x5a0   : > { %3387 = vmatpush3.bf16.msra.mxu1 %v1005_v1  ;;  %3388 = vmatprep.mubr.msk.bf16.mxu1 %vm3787_vm2, %v3786_v8  ;;  %v1153_v12 = vsel %vm560_vm4, %v1148_v9, 0 }
 0x5a1   : > { %v903_v5 = vpack.c.bf16 %v901_v4, %v901_v4  ;;  %3398 = vmatprep.subr.bf16.mxu1 %v3786_v8 }
 0x5a3   : > { %3383 = vmatmul.mubr.msk.bf16.vlgmr.msra.gmra.mrb[16].mxu0 %vm560_vm4, %v903_v5  ;;  %v1146_v13 = vpop.permute.xlu1 %1145 }
 0x5a4   : > { %3393 = vmatpush3.bf16.msra.mxu0 %v1052_v6  ;;  %3394 = vmatprep.mubr.msk.bf16.mxu0 %vm3787_vm2, %v3786_v8 }
 0x5a5   : > { %3404 = vmatprep.subr.bf16.mxu0 %v3786_v8 }
 0x5ab   : > { %3395 = vmatmul.mubr.msk.bf16.vlgmr.msra.gmra.mrb[20].mxu0 %vm560_vm4, %v777_v24 }
 0x5ac   : > { %3406 = vmatprep.mubr.msk.bf16.mxu0 %vm3787_vm2, %v3786_v8 }
 0x5ad   : > { %3405 = vmatpush3.bf16.xpose.msra.mxu0 %v1153_v12 }
 0x5ae   : > { %3416 = vmatprep.subr.bf16.mxu0 %v3786_v8 }
 0x5b4   : > { %3407 = vmatmul.mubr.msk.bf16.vlgmr.msra.gmra.mrb[24].mxu0 %vm560_vm4, %v1146_v13 }
 0x5b5   : > { %3418 = vmatprep.mubr.msk.bf16.mxu0 %vm3787_vm2, %v3786_v8 }
 0x672   : > { %v946_v17 = vpop.f32.mrb[12].mxu1 }
 0x673   : > { %v3378_v19 = vpop.f32.mrb[13].mxu1 }
 0x674   : > { %v949_v20 = vpop.f32.mrb[14].mxu1 }
 0x675   : > { %v3379_v18 = vpop.f32.mrb[15].mxu1 }
 0x676   : > { %v994_v21 = vpop.f32.mrb[16].mxu0 }
 0x677   : > { %v1000_v23 = vpack.c.bf16 %v994_v21, %v946_v17  ;;  %v3384_v24 = vpop.f32.mrb[17].mxu0  ;;  %v474_v21 = vld [vmem:[%s3884_s26 + $0x8] sm:$0xf] }
 0x678   : > { %v997_v26 = vpop.f32.mrb[18].mxu0 }
 0x679   : > { %v3385_v28 = vpop.f32.mrb[19].mxu0  ;;  %3389 = vmatmul.mubr.msk.bf16.vlgmr.msra.gmra.mrb[16].mxu1 %vm560_vm4, %v1000_v23  ;;  %v1320_v23 = vsel %vm685_vm5, %v474_v21, 0 }
 0x67a   : > { %3399 = vmatpush3.bf16.xpose.msra.mxu1 %v1103_v27  ;;  %3400 = vmatprep.mubr.msk.bf16.mxu1 %vm3787_vm2, %v3786_v8 }
 0x67b   : > { %3410 = vmatprep.subr.bf16.mxu1 %v3786_v8 }
 0x67e   : > { %v1088_v29 = vpop.f32.mrb[20].mxu0 }
 0x67f   : > { %v3396_v30 = vpop.f32.mrb[21].mxu0 }
 0x680   : > { %v1091_v35 = vpop.f32.mrb[22].mxu0 }
 0x681   : > { %v3397_v36 = vpop.f32.mrb[23].mxu0  ;;  %3401 = vmatmul.mubr.msk.bf16.vlgmr.msra.gmra.mrb[20].mxu1 %vm560_vm4, %v1096_v32 }
 0x682   : > { %3412 = vmatprep.mubr.msk.bf16.mxu1 %vm3787_vm2, %v3786_v8 }
 0x687   : > { %v1189_v37 = vpop.f32.mrb[24].mxu0 }
 0x688   : > { %v1190_v38 = vadd.f32 %v1189_v37, %v3956_v39  ;;  %v3408_v40 = vpop.f32.mrb[25].mxu0 }
 0x689   : > { %v1192_v41 = vpop.f32.mrb[26].mxu0 }
 0x68a   : > { %v3409_v42 = vpop.f32.mrb[27].mxu0  ;;  %v1198_v43 = vsel %vm560_vm4, %v1190_v38, -inf }
 0x68b   : > { %1199 = vmax.xlane.f32.xlu1 %v1198_v43 }
 0x69c   : > { %1219 = vrot.lane.b32.xlu1 %v3929_v22, %s3795_s12 }
 0x6a0   : > { %1367 = vrot.lane.b32.xlu1 %v3929_v22, %s3796_s14 }
 0x6a4   : > { %1417 = vrot.lane.b32.xlu1 %v3933_v25, %s3796_s14 }
 0x6a8   : > { %1415 = vrot.lane.b32.xlu1 %v3947_v33, %s3797_s10 }
 0x718   : > { %v1200_v44 = vpop.xlane.xlu1 %1199 }
 0x719   : > { %v1202_v47 = vsub.f32 %v1190_v38, %v1200_v44 }
 0x71b   : > { %v1205_v48 = vmul.f32 1.442695, %v1202_v47 }
 0x71c   : > { %v1220_v45 = vpop.permute.xlu1 %1219 }
 0x71d   : > { %v1225_v46 = vsel %vm685_vm5, %v1220_v45, 0  ;;  %3671 = vpow2.f32 %v1205_v48 }
 0x71e   : > { %3411 = vmatpush3.bf16.msra.mxu1 %v1225_v46 }
 0x71f   : > { %3422 = vmatprep.subr.bf16.mxu1 %v3786_v8 }
 0x720   : > { %v1368_v13 = vpop.permute.xlu1 %1367 }
 0x721   : > { %v1373_v19 = vsel %vm560_vm4, %v1368_v13, 0 }
 0x727   : > { %v3672_v60 = vpop.eup %3671 }
 0x728   : > { %v1210_v61 = vsel %vm560_vm4, %v3672_v60, 0.0 }
 0x74c   : > { %v1041_v49 = vpop.f32.mrb[16].mxu1 }
 0x74d   : > { %v4062_v50 = vadd.f32 %v1088_v29, %v1041_v49  ;;  %v3390_v51 = vpop.f32.mrb[17].mxu1  ;;  %v1418_v29 = vpop.permute.xlu1 %1417 }
 0x74e   : > { %v1044_v52 = vpop.f32.mrb[18].mxu1  ;;  %v1423_v37 = vsel %vm560_vm4, %v1418_v29, 0 }
 0x74f   : > { %v4064_v53 = vadd.f32 %v1091_v35, %v1044_v52  ;;  %v3391_v54 = vpop.f32.mrb[19].mxu1 }
 0x751   : > { %v1416_v46 = vpop.permute.xlu1 %1415 }
 0x754   : > { %v1139_v55 = vpop.f32.mrb[20].mxu1 }
 0x755   : > { %v1140_v33 = vadd.f32 %v1139_v55, %v3953_v34  ;;  %v3402_v56 = vpop.f32.mrb[21].mxu1 }
 0x756   : > { %v1142_v57 = vpop.f32.mrb[22].mxu1 }
 0x757   : > { %v3403_v58 = vpop.f32.mrb[23].mxu1  ;;  %v1195_v59 = vsel %vm560_vm4, %v1140_v33, -inf }
 0x758   : > { %1196 = vmax.xlane.f32.xlu0 %v1195_v59 }
 0x75c   : > { %1211 = vadd.xlane.f32.xlu0 %v1210_v61 }
 0x7e5   : > { %v1197_v62 = vpop.xlane.xlu0 %1196 }
 0x7e6   : > { %v1201_v63 = vsub.f32 %v1140_v33, %v1197_v62 }
 0x7e8   : > { %v1203_v0 = vmul.f32 1.442695, %v1201_v63 }
 0x7e9   : > { %v1212_v3 = vpop.xlane.xlu0 %1211 }
 0x7ea   : > { %3673 = vpow2.f32 %v1203_v0 }
 0x7eb   : > { %3675 = vrcp.f32 %v1212_v3 }
 0x7f4   : > { %v3674_v1 = vpop.eup %3673 }
 0x7f5   : > { %v1207_v2 = vsel %vm560_vm4, %v3674_v1, 0.0  ;;  %v3676_v4 = vpop.eup %3675 }
 0x7f6   : > { %1208 = vadd.xlane.f32.xlu0 %v1207_v2  ;;  %v1216_v6 = vmul.f32 %v3676_v4, %v3672_v60 }
 0x7f8   : > { %v1218_v12 = vpack.c.bf16 %v1216_v6, %v1216_v6 }
 0x80c   : > { %1267 = vrot.lane.b32.xlu0 %v3933_v25, %s3795_s12 }
 0x810   : > { %1365 = vrot.lane.b32.xlu0 %v3940_v31, %s3797_s10 }
 0x883   : > { %v1209_v5 = vpop.xlane.xlu0 %1208 }
 0x884   : > { %3677 = vrcp.f32 %v1209_v5 }
 0x887   : > { %v1268_v7 = vpop.permute.xlu0 %1267 }
 0x888   : > { %v1273_v9 = vsel %vm685_vm5, %v1268_v7, 0  ;;  %v475_v7 = vld [vmem:[%s3884_s26 + $0xc] sm:$0xf] }
 0x889   : > { %3417 = vmatpush3.bf16.msra.mxu0 %v1273_v9  ;;  %v1590_v9 = vsel %vm685_vm5, %v475_v7, 0 }
 0x88a   : > { %3428 = vmatprep.subr.bf16.mxu0 %v3786_v8 }
 0x88b   : > { %v1366_v18 = vpop.permute.xlu0 %1365 }
 0x88c   : > { %3419 = vmatmul.mubr.msk.bf16.vlgmr.msra.gmra.mrb[28].mxu0 %vm560_vm4, %v1218_v12 }
 0x88d   : > { %3430 = vmatprep.mubr.msk.bf16.mxu0 %vm3787_vm2, %v3786_v8 }
 0x88e   : > { %v3678_v31 = vpop.eup %3677 }
 0x88f   : > { %v1215_v17 = vmul.f32 %v3678_v31, %v3674_v1 }
 0x891   : > { %v1217_v20 = vpack.c.bf16 %v1215_v17, %v1215_v17 }
 0x892   : > { %3429 = vmatpush3.bf16.xpose.msra.mxu0 %v1373_v19 }
 0x893   : > { %3413 = vmatmul.mubr.msk.bf16.vlgmr.msra.gmra.mrb[24].mxu1 %vm560_vm4, %v1217_v20  ;;  %3440 = vmatprep.subr.bf16.mxu0 %v3786_v8 }
 0x894   : > { %3424 = vmatprep.mubr.msk.bf16.mxu1 %vm3787_vm2, %v3786_v8  ;;  %3423 = vmatpush3.bf16.msra.mxu1 %v1320_v23 }
 0x895   : > { %3434 = vmatprep.subr.bf16.mxu1 %v3786_v8 }
 0x899   : > { %3431 = vmatmul.mubr.msk.bf16.vlgmr.msra.gmra.mrb[32].mxu0 %vm560_vm4, %v1366_v18 }
 0x89a   : > { %3442 = vmatprep.mubr.msk.bf16.mxu0 %vm3787_vm2, %v3786_v8 }
 0x95f   : > { %v1309_v24 = vpop.f32.mrb[28].mxu0 }
 0x960   : > { %v3420_v26 = vpop.f32.mrb[29].mxu0 }
 0x961   : > { %v1312_v27 = vpop.f32.mrb[30].mxu0 }
 0x962   : > { %v3421_v28 = vpop.f32.mrb[31].mxu0 }
 0x966   : > { %v1261_v30 = vpop.f32.mrb[24].mxu1 }
 0x967   : > { %v1315_v32 = vpack.c.bf16 %v1309_v24, %v1261_v30  ;;  %v3414_v35 = vpop.f32.mrb[25].mxu1  ;;  %v4127_v30 = vld [vmem:[%s3879_s23] sm:$0xff] }
 0x968   : > { %v1264_v36 = vpop.f32.mrb[26].mxu1 }
 0x969   : > { %v3415_v38 = vpop.f32.mrb[27].mxu1  ;;  %3425 = vmatmul.mubr.msk.bf16.vlgmr.msra.gmra.mrb[28].mxu1 %vm560_vm4, %v1315_v32  ;;  %v1638_v32 = vrot.slane %v4127_v30, %v490_v15  ;;  %v3651_v15 = vld [vmem:[%s3869_s15 + $0x10] sm:$0xff]  }
 0x96a   : > { %3435 = vmatpush3.bf16.xpose.msra.mxu1 %v1423_v37  ;;  %3436 = vmatprep.mubr.msk.bf16.mxu1 %vm3787_vm2, %v3786_v8 }
 0x96b   : > { %3446 = vmatprep.subr.bf16.mxu1 %v3786_v8 }
 0x96c   : > { %v1409_v40 = vpop.f32.mrb[32].mxu0 }
 0x96d   : > { %v1410_v41 = vadd.f32 %v1409_v40, %v3953_v34  ;;  %v3432_v42 = vpop.f32.mrb[33].mxu0 }
 0x96e   : > { %v1412_v43 = vpop.f32.mrb[34].mxu0 }
 0x96f   : > { %v3433_v44 = vpop.f32.mrb[35].mxu0  ;;  %v1465_v45 = vsel %vm560_vm4, %v1410_v41, -inf }
 0x970   : > { %1466 = vmax.xlane.f32.xlu0 %v1465_v45 }
 0x971   : > { %3437 = vmatmul.mubr.msk.bf16.vlgmr.msra.gmra.mrb[32].mxu1 %vm560_vm4, %v1416_v46 }
 0x972   : > { %3448 = vmatprep.mubr.msk.bf16.mxu1 %vm3787_vm2, %v3786_v8 }
 0x9fd   : > { %v1467_v47 = vpop.xlane.xlu0 %1466 }
 0x9fe   : > { %v1471_v48 = vsub.f32 %v1410_v41, %v1467_v47 }
 0xa00   : > { %v1473_v49 = vmul.f32 1.442695, %v1471_v48  ;;  %v3652_v48 = vld [vmem:[%s3869_s15 + $0x18] sm:$0xff]  }
 0xa02   : > { %3679 = vpow2.f32 %v1473_v49 }
 0xa0c   : > { %v3680_v51 = vpop.eup %3679 }
 0xa0d   : > { %v1477_v52 = vsel %vm560_vm4, %v3680_v51, 0.0 }
 0xa0e   : > { %1478 = vadd.xlane.f32.xlu0 %v1477_v52 }
 0xa3c   : > { %v1356_v34 = vpop.f32.mrb[28].mxu1 }
 0xa3d   : > { %v1363_v54 = vadd.f32 %v1356_v34, %v4062_v50  ;;  %v3426_v55 = vpop.f32.mrb[29].mxu1 }
 0xa3e   : > { %v1359_v33 = vpop.f32.mrb[30].mxu1 }
 0xa3f   : > { %v4103_v56 = vadd.f32 %v1359_v33, %v4064_v53  ;;  %v3427_v57 = vpop.f32.mrb[31].mxu1 }
 0xa40   : > { %v1685_v57 = vsub.s32 1, %v3920_v14 }
 0xa44   : > { %v1459_v58 = vpop.f32.mrb[32].mxu1 }
 0xa45   : > { %v1460_v59 = vadd.f32 %v1459_v58, %v3956_v39  ;;  %v3438_v60 = vpop.f32.mrb[33].mxu1  ;;  %v1686_v58 = vrot.slane %v3924_v16, %v1685_v57 }
 0xa46   : > { %v1462_v61 = vpop.f32.mrb[34].mxu1 }
 0xa47   : > { %v3439_v62 = vpop.f32.mrb[35].mxu1  ;;  %v1468_v63 = vsel %vm560_vm4, %v1460_v59, -inf }
 0xa48   : > { %1469 = vmax.xlane.f32.xlu1 %v1468_v63 }
 0xa59   : > { %1489 = vrot.lane.b32.xlu1 %v3929_v22, %s3798_s16 }
 0xa9b   : > { %v1479_v0 = vpop.xlane.xlu0 %1478 }
 0xa9c   : > { %3681 = vrcp.f32 %v1479_v0 }
 0xaa6   : > { %v3682_v50 = vpop.eup %3681 }
 0xaa7   : > { %v1485_v2 = vmul.f32 %v3682_v50, %v3680_v51 }
 0xaa9   : > { %v1487_v5 = vpack.c.bf16 %v1485_v2, %v1485_v2 }
 0xad5   : > { %v1470_v1 = vpop.xlane.xlu1 %1469 }
 0xad6   : > { %v1472_v53 = vsub.f32 %v1460_v59, %v1470_v1  ;;  %v462_v1 = vld [vmem:[%s4424_s1] sm:$0xff] }
 0xad8   : > { %v1475_v3 = vmul.f32 1.442695, %v1472_v53  ;;  %v463_v53 = vld [vmem:[%s4424_s1 + $0x8] sm:$0xff] }
 0xad9   : > { %v1490_v4 = vpop.permute.xlu1 %1489  ;;  %v1743_v2 = vpack.c.bf16 %v463_v53, %v462_v1 }
 0xada   : > { %3683 = vpow2.f32 %v1475_v3  ;;  %v1495_v39 = vsel %vm685_vm5, %v1490_v4, 0  ;;  %v1672_v3 = vsub.s32 3, %v3920_v14 }
 0xadb   : > { %3441 = vmatpush3.bf16.msra.mxu0 %v1495_v39  ;;  %v1678_v39 = vsub.s32 4, %v3920_v14 }
 0xadc   : > { %3452 = vmatprep.subr.bf16.mxu0 %v3786_v8  ;;  %v1673_v4 = vrot.slane %v4127_v30, %v1672_v3 }
 0xade   : > { %3443 = vmatmul.mubr.msk.bf16.vlgmr.msra.gmra.mrb[36].mxu0 %vm560_vm4, %v1487_v5 }
 0xadf   : > { %3454 = vmatprep.mubr.msk.bf16.mxu0 %vm3787_vm2, %v3786_v8  ;;  %3453 = vmatpush3.bf16.msra.mxu0 %v1590_v9 }
 0xae0   : > { %3466 = vmatprep.subr.bf16.mxu0 %v3786_v8 }
 0xae4   : > { %v3684_v22 = vpop.eup %3683 }
 0xae5   : > { %v1480_v6 = vsel %vm560_vm4, %v3684_v22, 0.0 }
 0xae6   : > { %1481 = vadd.xlane.f32.xlu0 %v1480_v6 }
 0xafc   : > { %1537 = vrot.lane.b32.xlu0 %v3933_v25, %s3798_s16 }
 0xb73   : > { %v1482_v12 = vpop.xlane.xlu0 %1481 }
 0xb74   : > { %3685 = vrcp.f32 %v1482_v12  ;;  %v1679_v12 = vrot.slane %v4127_v30, %v1678_v39 }
 0xb77   : > { %v1538_v31 = vpop.permute.xlu0 %1537 }
 0xb78   : > { %v1543_v13 = vsel %vm685_vm5, %v1538_v31, 0 }
 0xb79   : > { %3447 = vmatpush3.bf16.msra.mxu1 %v1543_v13 }
 0xb7a   : > { %3458 = vmatprep.subr.bf16.mxu1 %v3786_v8 }
 0xb7e   : > { %v3686_v17 = vpop.eup %3685 }
 0xb7f   : > { %v1486_v19 = vmul.f32 %v3686_v17, %v3684_v22 }
 0xb81   : > { %v1488_v20 = vpack.c.bf16 %v1486_v19, %v1486_v19 }
 0xb83   : > { %3449 = vmatmul.mubr.msk.bf16.vlgmr.msra.gmra.mrb[36].mxu1 %vm560_vm4, %v1488_v20 }
 0xb84   : > { %3462 = vmatprep.mubr.msk.bf16.mxu1 %vm3787_vm2, %v3786_v8  ;;  %3459 = vmatpush3.bf16.msra.mxu1 %v3651_v15 }
 0xb85   : > { %3460 = vmatprep.subr.bf16.mxu1 %v3786_v8 }
 0xb88   : > { %3461 = vmatpush3.bf16.msra.mxu1 %v3652_v48 }
 0xb89   : > { %3474 = vmatprep.subr.bf16.mxu1 %v3786_v8 }
 0xbb1   : > { %v1531_v25 = vpop.f32.mrb[36].mxu0 }
 0xbb2   : > { %v3444_v18 = vpop.f32.mrb[37].mxu0 }
 0xbb3   : > { %v1534_v21 = vpop.f32.mrb[38].mxu0 }
 0xbb4   : > { %v3445_v23 = vpop.f32.mrb[39].mxu0 }
 0xc56   : > { %v1579_v24 = vpop.f32.mrb[36].mxu1 }
 0xc57   : > { %v1585_v26 = vpack.c.bf16 %v1579_v24, %v1531_v25  ;;  %v3450_v27 = vpop.f32.mrb[37].mxu1 }
 0xc58   : > { %v1582_v28 = vpop.f32.mrb[38].mxu1 }
 0xc59   : > { %v3451_v29 = vpop.f32.mrb[39].mxu1  ;;  %3455 = vmatmul.mubr.msk.bf16.vlgmr.msra.gmra.mrb[40].mxu0 %vm560_vm4, %v1585_v26 }
 0xc5a   : > { %3470 = vmatprep.mubr.msk.bf16.mxu0 %vm3787_vm2, %v3786_v8 }
 0xd2c   : > { %v1626_v35 = vpop.f32.mrb[40].mxu0 }
 0xd2d   : > { %v1633_v36 = vadd.f32 %v1626_v35, %v1363_v54  ;;  %v3456_v37 = vpop.f32.mrb[41].mxu0 }
 0xd2e   : > { %v1629_v38 = vpop.f32.mrb[42].mxu0 }
 0xd2f   : > { %v1639_v40 = vadd.f32 %v1638_v32, %v1633_v36  ;;  %v1634_v41 = vadd.f32 %v1629_v38, %v4103_v56  ;;  %v3457_v42 = vpop.f32.mrb[43].mxu0 }
 0xd31   : > { %v1640_v43 = vadd.f32 %v1638_v32, %v1634_v41  ;;  %v1641_v44 = vadd.f32 %v1639_v40, %v3907_v10 }
 0xd33   : > { %v1643_v45 = vsel %vm504_vm3, %v1641_v44, 0.0  ;;  %v1642_v46 = vadd.f32 %v1640_v43, %v3909_v11 }
 0xd34   : > { %1644 = vadd.xlane.f32.xlu1 %v1643_v45 }
 0xd35   : > { %v1646_v47 = vsel %vm504_vm3, %v1642_v46, 0.0 }
 0xd36   : > { %1647 = vadd.xlane.f32.xlu0 %v1646_v47 }
 0xdc1   : > { %v1645_v49 = vpop.xlane.xlu1 %1644 }
 0xdc2   : > { %v1650_v51 = vmul.f32 0.03125, %v1645_v49 }
 0xdc3   : > { %v1648_v52 = vpop.xlane.xlu0 %1647 }
 0xdc4   : > { %v1652_v10 = vsub.f32 %v1641_v44, %v1650_v51  ;;  %v1651_v34 = vmul.f32 0.03125, %v1648_v52 }
 0xdc6   : > { %v1653_v54 = vsub.f32 %v1642_v46, %v1651_v34  ;;  %v1654_v55 = vmul.f32 %v1652_v10, %v1652_v10 }
 0xdc8   : > { %v1656_v11 = vsel %vm504_vm3, %v1654_v55, 0.0  ;;  %v1655_v33 = vmul.f32 %v1653_v54, %v1653_v54 }
 0xdc9   : > { %1657 = vadd.xlane.f32.xlu1 %v1656_v11 }
 0xdca   : > { %v1659_v56 = vsel %vm504_vm3, %v1655_v33, 0.0 }
 0xdcb   : > { %1660 = vadd.xlane.f32.xlu0 %v1659_v56 }
 0xdda   : > { %1744 = vrot.lane.b32.xlu1 %v3651_v15, %s3788_s21 }
 0xdde   : > { %1751 = vrot.lane.b32.xlu1 %v1686_v58, %s3788_s21 }
 0xde1   : > { %1746 = vrot.lane.b32.xlu0 %v3652_v48, %s3788_s21 }
 0xe56   : > { %v1658_v59 = vpop.xlane.xlu1 %1657 }
 0xe57   : > { %v1662_v60 = vmul.f32 0.03125, %v1658_v59 }
 0xe58   : > { %v1661_v61 = vpop.xlane.xlu0 %1660 }
 0xe59   : > { %v1664_v62 = vadd.f32 1e-05, %v1662_v60  ;;  %v1663_v63 = vmul.f32 0.03125, %v1661_v61 }
 0xe5a   : > { %v1745_v0 = vpop.permute.xlu1 %1744 }
 0xe5b   : > { %3687 = vrsqrt.f32 %v1664_v62  ;;  %v1665_v50 = vadd.f32 1e-05, %v1663_v63  ;;  %3467 = vmatpush3.bf16.msra.mxu0 %v1745_v0 }
 0xe5c   : > { %3468 = vmatprep.subr.bf16.mxu0 %v3786_v8  ;;  %v1747_v16 = vpop.permute.xlu0 %1746 }
 0xe5d   : > { %3689 = vrsqrt.f32 %v1665_v50 }
 0xe5e   : > { %v1752_v20 = vpop.permute.xlu1 %1751 }
 0xe5f   : > { %3469 = vmatpush3.bf16.msra.mxu0 %v1747_v16 }
 0xe60   : > { %3480 = vmatprep.subr.bf16.mxu0 %v3786_v8 }
 0xe62   : > { %3471 = vmatmul.mubr.msk.bf16.vlgmr.msra.gmra.mrb[44].mxu0 %vm504_vm3, %v1743_v2 }
 0xe63   : > { %3482 = vmatprep.mubr.msk.bf16.mxu0 %vm3787_vm2, %v3786_v8 }
 0xe65   : > { %v3688_v5 = vpop.eup %3687 }
 0xe66   : > { %v1668_v22 = vmul.f32 %v3688_v5, %v1652_v10 }
 0xe67   : > { %v3690_v6 = vpop.eup %3689 }
 0xe68   : > { %v1674_v7 = vmul.f32 %v1673_v4, %v1668_v22  ;;  %v1669_v9 = vmul.f32 %v3690_v6, %v1653_v54 }
 0xe6a   : > { %v1675_v31 = vmul.f32 %v1673_v4, %v1669_v9  ;;  %v4165_v13 = vadd.f32 %v1679_v12, %v1674_v7 }
 0xe6c   : > { %v4167_v17 = vadd.f32 %v1679_v12, %v1675_v31 }
 0xe6e   : > { %v1682_v19 = vpack.c.bf16 %v4167_v17, %v4165_v13 }
 0xe70   : > { %3463 = vmatmul.mubr.msk.bf16.vlgmr.msra.gmra.mrb[40].mxu1 %vm504_vm3, %v1682_v19 }
 0xe71   : > { %3476 = vmatprep.mubr.msk.bf16.mxu1 %vm3787_vm2, %v3786_v8 }
 0xf35   : > { %v1791_v25 = vpop.f32.mrb[44].mxu0 }
 0xf36   : > { %v3472_v18 = vpop.f32.mrb[45].mxu0  ;;  %v1792_v21 = vadd.f32 %v1791_v25, %v1752_v20 }
 0xf37   : > { %v1794_v23 = vpop.f32.mrb[46].mxu0 }
 0xf38   : > { %v1795_v24 = vadd.f32 %v1794_v23, %v1752_v20  ;;  %v4174_v26 = vpack.c.bf16 %v1792_v21, %v1792_v21  ;;  %v3473_v27 = vpop.f32.mrb[47].mxu0 }
 0xf3a   : > { %v4176_v28 = vpack.c.bf16 %v1795_v24, %v1795_v24  ;;  %v1808_v29 = vsel %vm560_vm4, %v4174_v26, 0 }
 0xf3b   : > { %3475 = vmatpush3.bf16.xpose.msra.mxu1 %v1808_v29 }
 0xf3c   : > { %v1854_v32 = vsel %vm560_vm4, %v4176_v28, 0  ;;  %3486 = vmatprep.subr.bf16.mxu1 %v3786_v8 }
 0xf3d   : > { %3481 = vmatpush3.bf16.xpose.msra.mxu0 %v1854_v32 }
 0xf3e   : > { %3492 = vmatprep.subr.bf16.mxu0 %v3786_v8 }
 0xf43   : > { %v1736_v35 = vpop.f32.mrb[40].mxu1 }
 0xf44   : > { %v1737_v36 = vadd.f32 %v1736_v35, %v1686_v58  ;;  %v3464_v37 = vpop.f32.mrb[41].mxu1 }
 0xf45   : > { %v1739_v38 = vpop.f32.mrb[42].mxu1 }
 0xf46   : > { %v1798_v40 = vmul.f32 0.35355338, %v1737_v36  ;;  %v1740_v41 = vadd.f32 %v1739_v38, %v1686_v58  ;;  %v3465_v42 = vpop.f32.mrb[43].mxu1 }
 0xf48   : > { %v4184_v43 = vpack.c.bf16 %v1798_v40, %v1798_v40  ;;  %v1799_v44 = vmul.f32 0.35355338, %v1740_v41 }
 0xf4a   : > { %v4186_v45 = vpack.c.bf16 %v1799_v44, %v1799_v44  ;;  %3477 = vmatmul.mubr.msk.bf16.vlgmr.msra.gmra.mrb[44].mxu1 %vm560_vm4, %v4184_v43 }
 0xf4b   : > { %3488 = vmatprep.mubr.msk.bf16.mxu1 %vm3787_vm2, %v3786_v8 }
 0xf4c   : > { %3483 = vmatmul.mubr.msk.bf16.vlgmr.msra.gmra.mrb[48].mxu0 %vm560_vm4, %v4186_v45 }
 0xf4d   : > { %3494 = vmatprep.mubr.msk.bf16.mxu0 %vm3787_vm2, %v3786_v8 }
0x101d   : > { %v1844_v46 = vpop.f32.mrb[44].mxu1 }
0x101e   : > { %v3478_v47 = vpop.f32.mrb[45].mxu1  ;;  %v1896_v15 = vsel %vm560_vm4, %v1844_v46, -inf }
0x101f   : > { %1897 = vmax.xlane.f32.xlu1 %v1896_v15  ;;  %v1847_v48 = vpop.f32.mrb[46].mxu1  ;;  %v1890_v49 = vpop.f32.mrb[48].mxu0 }
0x1020   : > { %v3479_v51 = vpop.f32.mrb[47].mxu1  ;;  %v3484_v52 = vpop.f32.mrb[49].mxu0  ;;  %v1899_v10 = vsel %vm560_vm4, %v1890_v49, -inf }
0x1021   : > { %1900 = vmax.xlane.f32.xlu0 %v1899_v10  ;;  %v1893_v34 = vpop.f32.mrb[50].mxu0 }
0x1022   : > { %v3485_v54 = vpop.f32.mrb[51].mxu0 }
0x1030   : > { %1970 = vrot.lane.b32.xlu1 %v4176_v28, %s3788_s21 }
0x1037   : > { %1921 = vrot.lane.b32.xlu0 %v4174_v26, %s3788_s21 }
0x10ac   : > { %v1898_v55 = vpop.xlane.xlu1 %1897 }
0x10ad   : > { %v1902_v11 = vsub.f32 %v1844_v46, %v1898_v55 }
0x10ae   : > { %v1901_v33 = vpop.xlane.xlu0 %1900 }
0x10af   : > { %v1904_v56 = vmul.f32 1.442695, %v1902_v11  ;;  %v1903_v58 = vsub.f32 %v1890_v49, %v1901_v33 }
0x10b0   : > { %v1971_v59 = vpop.permute.xlu1 %1970 }
0x10b1   : > { %3691 = vpow2.f32 %v1904_v56  ;;  %v1906_v60 = vmul.f32 1.442695, %v1903_v58  ;;  %v1976_v61 = vsel %vm685_vm5, %v1971_v59, 0 }
0x10b2   : > { %3493 = vmatpush3.bf16.msra.mxu0 %v1976_v61  ;;  %v1922_v62 = vpop.permute.xlu0 %1921 }
0x10b3   : > { %3693 = vpow2.f32 %v1906_v60  ;;  %v1927_v63 = vsel %vm685_vm5, %v1922_v62, 0  ;;  %3504 = vmatprep.subr.bf16.mxu0 %v3786_v8 }
0x10b4   : > { %3487 = vmatpush3.bf16.msra.mxu1 %v1927_v63 }
0x10b5   : > { %3498 = vmatprep.subr.bf16.mxu1 %v3786_v8 }
0x10bb   : > { %v3692_v0 = vpop.eup %3691 }
0x10bc   : > { %v1908_v50 = vsel %vm560_vm4, %v3692_v0, 0.0 }
0x10bd   : > { %v3694_v1 = vpop.eup %3693  ;;  %1909 = vadd.xlane.f32.xlu0 %v1908_v50 }
0x10be   : > { %v1911_v53 = vsel %vm560_vm4, %v3694_v1, 0.0 }
0x10bf   : > { %1912 = vadd.xlane.f32.xlu1 %v1911_v53  ;;  %v476_v53 = vld [vmem:[%s3884_s26 + $0x10] sm:$0xf] }
0x10d0   : > { %2022 = vrot.lane.b32.xlu1 %v4174_v26, %s3791_s24 }
0x10d3   : > { %2073 = vrot.lane.b32.xlu0 %v4176_v28, %s3791_s24 }
0x10d4   : > { %2020 = vrot.lane.b32.xlu1 %v4184_v43, %s3791_s24 }
0x10d7   : > { %2071 = vrot.lane.b32.xlu0 %v4186_v45, %s3791_s24 }
0x114a   : > { %v1910_v16 = vpop.xlane.xlu0 %1909 }
0x114b   : > { %3695 = vrcp.f32 %v1910_v16 }
0x114c   : > { %v1913_v2 = vpop.xlane.xlu1 %1912 }
0x114d   : > { %3697 = vrcp.f32 %v1913_v2 }
0x114e   : > { %v2074_v7 = vpop.permute.xlu0 %2073 }
0x114f   : > { %v2079_v31 = vsel %vm560_vm4, %v2074_v7, 0 }
0x1150   : > { %v2023_v5 = vpop.permute.xlu1 %2022 }
0x1151   : > { %v2028_v9 = vsel %vm560_vm4, %v2023_v5, 0 }
0x1152   : > { %v2072_v20 = vpop.permute.xlu0 %2071 }
0x1154   : > { %v2021_v19 = vpop.permute.xlu1 %2020 }
0x1155   : > { %v3696_v3 = vpop.eup %3695 }
0x1156   : > { %v1916_v4 = vmul.f32 %v3696_v3, %v3692_v0  ;;  %v477_v0 = vld [vmem:[%s3884_s26 + $0x14] sm:$0xf] }
0x1157   : > { %v3698_v39 = vpop.eup %3697  ;;  %v2246_v3 = vsel %vm685_vm5, %v477_v0, 0 }
0x1158   : > { %v1917_v22 = vmul.f32 %v3698_v39, %v3694_v1  ;;  %v1918_v6 = vpack.c.bf16 %v1916_v4, %v1916_v4  ;;  %v2293_v39 = vsel %vm685_vm5, %v476_v53, 0 }
0x115a   : > { %3489 = vmatmul.mubr.msk.bf16.vlgmr.msra.gmra.mrb[48].mxu1 %vm560_vm4, %v1918_v6  ;;  %v1919_v12 = vpack.c.bf16 %v1917_v22, %v1917_v22 }
0x115b   : > { %3499 = vmatpush3.bf16.xpose.msra.mxu1 %v2028_v9  ;;  %3500 = vmatprep.mubr.msk.bf16.mxu1 %vm3787_vm2, %v3786_v8 }
0x115c   : > { %3495 = vmatmul.mubr.msk.bf16.vlgmr.msra.gmra.mrb[52].mxu0 %vm560_vm4, %v1919_v12  ;;  %3510 = vmatprep.subr.bf16.mxu1 %v3786_v8 }
0x115d   : > { %3505 = vmatpush3.bf16.xpose.msra.mxu0 %v2079_v31  ;;  %3506 = vmatprep.mubr.msk.bf16.mxu0 %vm3787_vm2, %v3786_v8 }
0x115e   : > { %3516 = vmatprep.subr.bf16.mxu0 %v3786_v8 }
0x1162   : > { %3501 = vmatmul.mubr.msk.bf16.vlgmr.msra.gmra.mrb[52].mxu1 %vm560_vm4, %v2021_v19 }
0x1163   : > { %3512 = vmatprep.mubr.msk.bf16.mxu1 %vm3787_vm2, %v3786_v8 }
0x1164   : > { %3507 = vmatmul.mubr.msk.bf16.vlgmr.msra.gmra.mrb[56].mxu0 %vm560_vm4, %v2072_v20 }
0x1165   : > { %3518 = vmatprep.mubr.msk.bf16.mxu0 %vm3787_vm2, %v3786_v8 }
0x122d   : > { %v4232_v25 = vpop.f32.mrb[48].mxu1 }
0x122e   : > { %v3490_v18 = vpop.f32.mrb[49].mxu1 }
0x122f   : > { %v1966_v21 = vpop.f32.mrb[50].mxu1  ;;  %v4234_v23 = vpop.f32.mrb[52].mxu0 }
0x1230   : > { %v2018_v24 = vpack.c.bf16 %v4234_v23, %v4232_v25  ;;  %v3491_v27 = vpop.f32.mrb[51].mxu1  ;;  %v3496_v29 = vpop.f32.mrb[53].mxu0 }
0x1231   : > { %v2015_v32 = vpop.f32.mrb[54].mxu0 }
0x1232   : > { %v3497_v35 = vpop.f32.mrb[55].mxu0 }
0x1235   : > { %v2064_v36 = vpop.f32.mrb[52].mxu1 }
0x1236   : > { %v3502_v37 = vpop.f32.mrb[53].mxu1  ;;  %v2121_v38 = vsel %vm560_vm4, %v2064_v36, -inf }
0x1237   : > { %2122 = vmax.xlane.f32.xlu1 %v2121_v38  ;;  %v2067_v40 = vpop.f32.mrb[54].mxu1  ;;  %v2115_v41 = vpop.f32.mrb[56].mxu0 }
0x1238   : > { %v3503_v42 = vpop.f32.mrb[55].mxu1  ;;  %v3508_v44 = vpop.f32.mrb[57].mxu0  ;;  %v2124_v46 = vsel %vm560_vm4, %v2115_v41, -inf }
0x1239   : > { %2125 = vmax.xlane.f32.xlu0 %v2124_v46  ;;  %v2118_v47 = vpop.f32.mrb[58].mxu0 }
0x123a   : > { %v3509_v15 = vpop.f32.mrb[59].mxu0 }
0x12c4   : > { %v2123_v48 = vpop.xlane.xlu1 %2122 }
0x12c5   : > { %v2127_v49 = vsub.f32 %v2064_v36, %v2123_v48 }
0x12c6   : > { %v2126_v51 = vpop.xlane.xlu0 %2125 }
0x12c7   : > { %v2129_v52 = vmul.f32 1.442695, %v2127_v49  ;;  %v2128_v10 = vsub.f32 %v2115_v41, %v2126_v51 }
0x12c9   : > { %3699 = vpow2.f32 %v2129_v52  ;;  %v2131_v34 = vmul.f32 1.442695, %v2128_v10 }
0x12cb   : > { %3701 = vpow2.f32 %v2131_v34 }
0x12d3   : > { %v3700_v54 = vpop.eup %3699 }
0x12d4   : > { %v2133_v55 = vsel %vm560_vm4, %v3700_v54, 0.0 }
0x12d5   : > { %v3702_v11 = vpop.eup %3701  ;;  %2134 = vadd.xlane.f32.xlu0 %v2133_v55 }
0x12d6   : > { %v2136_v33 = vsel %vm560_vm4, %v3702_v11, 0.0 }
0x12d7   : > { %2137 = vadd.xlane.f32.xlu1 %v2136_v33 }
0x12e8   : > { %2193 = vrot.lane.b32.xlu1 %v4176_v28, %s3790_s22 }
0x12eb   : > { %2145 = vrot.lane.b32.xlu0 %v4174_v26, %s3790_s22 }
0x12ec   : > { %2338 = vrot.lane.b32.xlu1 %v4174_v26, %s3793_s11 }
0x12ef   : > { %2388 = vrot.lane.b32.xlu0 %v4176_v28, %s3793_s11 }
0x12f0   : > { %2336 = vrot.lane.b32.xlu1 %v4184_v43, %s3793_s11 }
0x12f3   : > { %2386 = vrot.lane.b32.xlu0 %v4186_v45, %s3793_s11 }
0x1362   : > { %v2135_v56 = vpop.xlane.xlu0 %2134 }
0x1363   : > { %3703 = vrcp.f32 %v2135_v56 }
0x1364   : > { %v2138_v58 = vpop.xlane.xlu1 %2137 }
0x1365   : > { %3705 = vrcp.f32 %v2138_v58 }
0x1366   : > { %v2146_v59 = vpop.permute.xlu0 %2145 }
0x1367   : > { %v2151_v60 = vsel %vm685_vm5, %v2146_v59, 0 }
0x1368   : > { %v2194_v61 = vpop.permute.xlu1 %2193  ;;  %3511 = vmatpush3.bf16.msra.mxu1 %v2151_v60 }
0x1369   : > { %v2199_v62 = vsel %vm685_vm5, %v2194_v61, 0  ;;  %3522 = vmatprep.subr.bf16.mxu1 %v3786_v8 }
0x136a   : > { %3517 = vmatpush3.bf16.msra.mxu0 %v2199_v62  ;;  %v2389_v5 = vpop.permute.xlu0 %2388 }
0x136b   : > { %3528 = vmatprep.subr.bf16.mxu0 %v3786_v8  ;;  %v2394_v22 = vsel %vm560_vm4, %v2389_v5, 0 }
0x136c   : > { %v2339_v9 = vpop.permute.xlu1 %2338 }
0x136d   : > { %v3704_v63 = vpop.eup %3703  ;;  %v2344_v23 = vsel %vm560_vm4, %v2339_v9, 0 }
0x136e   : > { %v2141_v50 = vmul.f32 %v3704_v63, %v3700_v54  ;;  %v2387_v6 = vpop.permute.xlu0 %2386 }
0x136f   : > { %v3706_v1 = vpop.eup %3705 }
0x1370   : > { %v2142_v16 = vmul.f32 %v3706_v1, %v3702_v11  ;;  %v2143_v2 = vpack.c.bf16 %v2141_v50, %v2141_v50  ;;  %v2337_v32 = vpop.permute.xlu1 %2336 }
0x1372   : > { %3513 = vmatmul.mubr.msk.bf16.vlgmr.msra.gmra.mrb[56].mxu1 %vm560_vm4, %v2143_v2  ;;  %v2144_v4 = vpack.c.bf16 %v2142_v16, %v2142_v16 }
0x1373   : > { %3523 = vmatpush3.bf16.msra.mxu1 %v2246_v3  ;;  %3524 = vmatprep.mubr.msk.bf16.mxu1 %vm3787_vm2, %v3786_v8 }
0x1374   : > { %3519 = vmatmul.mubr.msk.bf16.vlgmr.msra.gmra.mrb[60].mxu0 %vm560_vm4, %v2144_v4  ;;  %3534 = vmatprep.subr.bf16.mxu1 %v3786_v8 }
0x1375   : > { %3529 = vmatpush3.bf16.msra.mxu0 %v2293_v39  ;;  %3530 = vmatprep.mubr.msk.bf16.mxu0 %vm3787_vm2, %v3786_v8 }
0x1376   : > { %3540 = vmatprep.subr.bf16.mxu0 %v3786_v8 }
0x137c   : > { %3531 = vmatmul.mubr.msk.bf16.vlgmr.msra.gmra.mrb[64].mxu0 %vm560_vm4, %v2018_v24 }
0x137d   : > { %3542 = vmatprep.mubr.msk.bf16.mxu0 %vm3787_vm2, %v3786_v8 }
0x137e   : > { %3541 = vmatpush3.bf16.xpose.msra.mxu0 %v2394_v22 }
0x137f   : > { %3552 = vmatprep.subr.bf16.mxu0 %v3786_v8 }
0x1385   : > { %3543 = vmatmul.mubr.msk.bf16.vlgmr.msra.gmra.mrb[68].mxu0 %vm560_vm4, %v2387_v6 }
0x1386   : > { %3554 = vmatprep.mubr.msk.bf16.mxu0 %vm3787_vm2, %v3786_v8 }
0x1445   : > { %v2187_v7 = vpop.f32.mrb[56].mxu1 }
0x1446   : > { %v3514_v12 = vpop.f32.mrb[57].mxu1 }
0x1447   : > { %v2190_v31 = vpop.f32.mrb[58].mxu1  ;;  %v2235_v19 = vpop.f32.mrb[60].mxu0 }
0x1448   : > { %v2241_v20 = vpack.c.bf16 %v2235_v19, %v2187_v7  ;;  %v3515_v25 = vpop.f32.mrb[59].mxu1  ;;  %v3520_v18 = vpop.f32.mrb[61].mxu0  ;;  %v478_v7 = vld [vmem:[%s3884_s26 + $0x18] sm:$0xf] }
0x1449   : > { %v2238_v21 = vpop.f32.mrb[62].mxu0  ;;  %v2561_v31 = vsel %vm685_vm5, %v478_v7, 0 }
0x144a   : > { %v3521_v24 = vpop.f32.mrb[63].mxu0  ;;  %3525 = vmatmul.mubr.msk.bf16.vlgmr.msra.gmra.mrb[60].mxu1 %vm560_vm4, %v2241_v20 }
0x144b   : > { %3535 = vmatpush3.bf16.xpose.msra.mxu1 %v2344_v23  ;;  %3536 = vmatprep.mubr.msk.bf16.mxu1 %vm3787_vm2, %v3786_v8 }
0x144c   : > { %3546 = vmatprep.subr.bf16.mxu1 %v3786_v8 }
0x144f   : > { %v2329_v27 = vpop.f32.mrb[64].mxu0 }
0x1450   : > { %v3532_v29 = vpop.f32.mrb[65].mxu0 }
0x1451   : > { %v2332_v35 = vpop.f32.mrb[66].mxu0 }
0x1452   : > { %v3533_v36 = vpop.f32.mrb[67].mxu0  ;;  %3537 = vmatmul.mubr.msk.bf16.vlgmr.msra.gmra.mrb[64].mxu1 %vm560_vm4, %v2337_v32 }
0x1453   : > { %3548 = vmatprep.mubr.msk.bf16.mxu1 %vm3787_vm2, %v3786_v8 }
0x1458   : > { %v2430_v37 = vpop.f32.mrb[68].mxu0 }
0x1459   : > { %v3544_v38 = vpop.f32.mrb[69].mxu0  ;;  %v2439_v40 = vsel %vm560_vm4, %v2430_v37, -inf }
0x145a   : > { %2440 = vmax.xlane.f32.xlu0 %v2439_v40  ;;  %v2433_v41 = vpop.f32.mrb[70].mxu0 }
0x145b   : > { %v3545_v42 = vpop.f32.mrb[71].mxu0 }
0x14e7   : > { %v2441_v44 = vpop.xlane.xlu0 %2440 }
0x14e8   : > { %v2443_v46 = vsub.f32 %v2430_v37, %v2441_v44 }
0x14ea   : > { %v2446_v47 = vmul.f32 1.442695, %v2443_v46 }
0x14ec   : > { %3707 = vpow2.f32 %v2446_v47 }
0x14f6   : > { %v3708_v11 = vpop.eup %3707 }
0x14f7   : > { %v2451_v58 = vsel %vm560_vm4, %v3708_v11, 0.0 }
0x151d   : > { %v2282_v15 = vpop.f32.mrb[60].mxu1 }
0x151e   : > { %v4290_v48 = vadd.f32 %v2329_v27, %v2282_v15  ;;  %v3526_v49 = vpop.f32.mrb[61].mxu1 }
0x151f   : > { %v2285_v51 = vpop.f32.mrb[62].mxu1 }
0x1520   : > { %v4292_v52 = vadd.f32 %v2332_v35, %v2285_v51  ;;  %v3527_v10 = vpop.f32.mrb[63].mxu1 }
0x1525   : > { %v2380_v34 = vpop.f32.mrb[64].mxu1 }
0x1526   : > { %v3538_v54 = vpop.f32.mrb[65].mxu1  ;;  %v2436_v55 = vsel %vm560_vm4, %v2380_v34, -inf }
0x1527   : > { %2437 = vmax.xlane.f32.xlu1 %v2436_v55  ;;  %v2383_v33 = vpop.f32.mrb[66].mxu1 }
0x1528   : > { %v3539_v56 = vpop.f32.mrb[67].mxu1 }
0x152b   : > { %2452 = vadd.xlane.f32.xlu1 %v2451_v58 }
0x153c   : > { %2508 = vrot.lane.b32.xlu1 %v4176_v28, %s3794_s13 }
0x1540   : > { %2608 = vrot.lane.b32.xlu1 %v4174_v26, %s3797_s10 }
0x1544   : > { %2606 = vrot.lane.b32.xlu1 %v4184_v43, %s3797_s10 }
0x15b4   : > { %v2438_v59 = vpop.xlane.xlu1 %2437 }
0x15b5   : > { %v2442_v60 = vsub.f32 %v2380_v34, %v2438_v59 }
0x15b7   : > { %v2444_v61 = vmul.f32 1.442695, %v2442_v60 }
0x15b8   : > { %v2453_v62 = vpop.xlane.xlu1 %2452 }
0x15b9   : > { %3709 = vpow2.f32 %v2444_v61 }
0x15ba   : > { %3711 = vrcp.f32 %v2453_v62 }
0x15bc   : > { %v2509_v63 = vpop.permute.xlu1 %2508 }
0x15bd   : > { %v2514_v0 = vsel %vm685_vm5, %v2509_v63, 0 }
0x15be   : > { %3553 = vmatpush3.bf16.msra.mxu0 %v2514_v0 }
0x15bf   : > { %3564 = vmatprep.subr.bf16.mxu0 %v3786_v8 }
0x15c0   : > { %v2609_v2 = vpop.permute.xlu1 %2608 }
0x15c1   : > { %v2614_v3 = vsel %vm560_vm4, %v2609_v2, 0 }
0x15c3   : > { %v3710_v50 = vpop.eup %3709 }
0x15c4   : > { %v3712_v1 = vpop.eup %3711  ;;  %v2448_v53 = vsel %vm560_vm4, %v3710_v50, 0.0  ;;  %v2607_v4 = vpop.permute.xlu1 %2606 }
0x15c5   : > { %v2457_v16 = vmul.f32 %v3712_v1, %v3708_v11  ;;  %2449 = vadd.xlane.f32.xlu0 %v2448_v53 }
0x15c7   : > { %v2459_v43 = vpack.c.bf16 %v2457_v16, %v2457_v16  ;;  %v479_v16 = vld [vmem:[%s3884_s26 + $0x1c] sm:$0xf] }
0x15c8   : > { %v2831_v2 = vsel %vm685_vm5, %v479_v16, 0 }
0x15c9   : > { %3555 = vmatmul.mubr.msk.bf16.vlgmr.msra.gmra.mrb[72].mxu0 %vm560_vm4, %v2459_v43 }
0x15ca   : > { %3565 = vmatpush3.bf16.xpose.msra.mxu0 %v2614_v3  ;;  %3566 = vmatprep.mubr.msk.bf16.mxu0 %vm3787_vm2, %v3786_v8 }
0x15cb   : > { %3576 = vmatprep.subr.bf16.mxu0 %v3786_v8 }
0x15d1   : > { %3567 = vmatmul.mubr.msk.bf16.vlgmr.msra.gmra.mrb[76].mxu0 %vm560_vm4, %v2607_v4 }
0x15d2   : > { %3578 = vmatprep.mubr.msk.bf16.mxu0 %vm3787_vm2, %v3786_v8 }
0x15db   : > { %2460 = vrot.lane.b32.xlu0 %v4174_v26, %s3794_s13 }
0x15df   : > { %2658 = vrot.lane.b32.xlu0 %v4176_v28, %s3797_s10 }
0x15e3   : > { %2656 = vrot.lane.b32.xlu0 %v4186_v45, %s3797_s10 }
0x1652   : > { %v2450_v39 = vpop.xlane.xlu0 %2449 }
0x1653   : > { %3713 = vrcp.f32 %v2450_v39 }
0x1656   : > { %v2461_v5 = vpop.permute.xlu0 %2460 }
0x1657   : > { %v2466_v22 = vsel %vm685_vm5, %v2461_v5, 0 }
0x1658   : > { %3547 = vmatpush3.bf16.msra.mxu1 %v2466_v22 }
0x1659   : > { %3558 = vmatprep.subr.bf16.mxu1 %v3786_v8 }
0x165a   : > { %v2659_v29 = vpop.permute.xlu0 %2658 }
0x165b   : > { %v2664_v38 = vsel %vm560_vm4, %v2659_v29, 0 }
0x165d   : > { %v3714_v6 = vpop.eup %3713 }
0x165e   : > { %v2456_v9 = vmul.f32 %v3714_v6, %v3710_v50  ;;  %v2657_v41 = vpop.permute.xlu0 %2656 }
0x1660   : > { %v2458_v12 = vpack.c.bf16 %v2456_v9, %v2456_v9 }
0x1662   : > { %3549 = vmatmul.mubr.msk.bf16.vlgmr.msra.gmra.mrb[68].mxu1 %vm560_vm4, %v2458_v12 }
0x1663   : > { %3559 = vmatpush3.bf16.msra.mxu1 %v2561_v31  ;;  %3560 = vmatprep.mubr.msk.bf16.mxu1 %vm3787_vm2, %v3786_v8 }
0x1664   : > { %3570 = vmatprep.subr.bf16.mxu1 %v3786_v8 }
0x169c   : > { %v2550_v45 = vpop.f32.mrb[72].mxu0 }
0x169d   : > { %v3556_v19 = vpop.f32.mrb[73].mxu0 }
0x169e   : > { %v2553_v20 = vpop.f32.mrb[74].mxu0 }
0x169f   : > { %v3557_v25 = vpop.f32.mrb[75].mxu0 }
0x16a0   : > { %v2879_v25 = vrot.slane %v4127_v30, %v1685_v57 }
0x16a4   : > { %v2650_v18 = vpop.f32.mrb[76].mxu0 }
0x16a5   : > { %v3568_v21 = vpop.f32.mrb[77].mxu0  ;;  %v2706_v23 = vsel %vm560_vm4, %v2650_v18, -inf }
0x16a6   : > { %2707 = vmax.xlane.f32.xlu1 %v2706_v23  ;;  %v2653_v24 = vpop.f32.mrb[78].mxu0 }
0x16a7   : > { %v3569_v27 = vpop.f32.mrb[79].mxu0 }
0x1733   : > { %v2708_v42 = vpop.xlane.xlu1 %2707 }
0x1734   : > { %v2712_v44 = vsub.f32 %v2650_v18, %v2708_v42 }
0x1735   : > { %v2502_v32 = vpop.f32.mrb[68].mxu1 }
0x1736   : > { %v2556_v35 = vpack.c.bf16 %v2550_v45, %v2502_v32  ;;  %v3550_v36 = vpop.f32.mrb[69].mxu1  ;;  %v2714_v46 = vmul.f32 1.442695, %v2712_v44 }
0x1737   : > { %v2505_v37 = vpop.f32.mrb[70].mxu1 }
0x1738   : > { %v3551_v40 = vpop.f32.mrb[71].mxu1  ;;  %3561 = vmatmul.mubr.msk.bf16.vlgmr.msra.gmra.mrb[72].mxu1 %vm560_vm4, %v2556_v35  ;;  %3715 = vpow2.f32 %v2714_v46 }
0x1739   : > { %3571 = vmatpush3.bf16.xpose.msra.mxu1 %v2664_v38  ;;  %3572 = vmatprep.mubr.msk.bf16.mxu1 %vm3787_vm2, %v3786_v8 }
0x173a   : > { %3582 = vmatprep.subr.bf16.mxu1 %v3786_v8 }
0x1740   : > { %3573 = vmatmul.mubr.msk.bf16.vlgmr.msra.gmra.mrb[76].mxu1 %vm560_vm4, %v2657_v41 }
0x1741   : > { %3584 = vmatprep.mubr.msk.bf16.mxu1 %vm3787_vm2, %v3786_v8 }
0x1742   : > { %v3716_v33 = vpop.eup %3715 }
0x1743   : > { %v2718_v59 = vsel %vm560_vm4, %v3716_v33, 0.0 }
0x180b   : > { %v2597_v47 = vpop.f32.mrb[72].mxu1 }
0x180c   : > { %v2604_v15 = vadd.f32 %v2597_v47, %v4290_v48  ;;  %v3562_v49 = vpop.f32.mrb[73].mxu1 }
0x180d   : > { %v2600_v51 = vpop.f32.mrb[74].mxu1 }
0x180e   : > { %v2605_v10 = vadd.f32 %v2600_v51, %v4292_v52  ;;  %v3563_v34 = vpop.f32.mrb[75].mxu1 }
0x1813   : > { %v2700_v54 = vpop.f32.mrb[76].mxu1 }
0x1814   : > { %v3574_v55 = vpop.f32.mrb[77].mxu1  ;;  %v2709_v11 = vsel %vm560_vm4, %v2700_v54, -inf }
0x1815   : > { %2710 = vmax.xlane.f32.xlu0 %v2709_v11  ;;  %v2703_v56 = vpop.f32.mrb[78].mxu1 }
0x1816   : > { %v3575_v58 = vpop.f32.mrb[79].mxu1 }
0x1817   : > { %v2912_v58 = vsub.s32 5, %v3920_v14 }
0x1819   : > { %2719 = vadd.xlane.f32.xlu0 %v2718_v59  ;;  %v2913_v59 = vrot.slane %v4127_v30, %v2912_v58 }
0x182f   : > { %2730 = vrot.lane.b32.xlu0 %v4174_v26, %s3796_s14 }
0x18a2   : > { %v2711_v48 = vpop.xlane.xlu0 %2710 }
0x18a3   : > { %v2713_v60 = vsub.f32 %v2700_v54, %v2711_v48  ;;  %v2918_v48 = vsub.s32 6, %v3920_v14 }
0x18a5   : > { %v2716_v61 = vmul.f32 1.442695, %v2713_v60 }
0x18a6   : > { %v2720_v62 = vpop.xlane.xlu0 %2719 }
0x18a7   : > { %3717 = vpow2.f32 %v2716_v61 }
0x18a8   : > { %3719 = vrcp.f32 %v2720_v62 }
0x18aa   : > { %v2731_v52 = vpop.permute.xlu0 %2730 }
0x18ab   : > { %v2736_v63 = vsel %vm685_vm5, %v2731_v52, 0 }
0x18ac   : > { %3577 = vmatpush3.bf16.msra.mxu0 %v2736_v63  ;;  %v2919_v63 = vrot.slane %v4127_v30, %v2918_v48 }
0x18ad   : > { %3588 = vmatprep.subr.bf16.mxu0 %v3786_v8 }
0x18b1   : > { %v3718_v0 = vpop.eup %3717 }
0x18b2   : > { %v3720_v50 = vpop.eup %3719  ;;  %v2721_v1 = vsel %vm560_vm4, %v3718_v0, 0.0 }
0x18b3   : > { %v2726_v53 = vmul.f32 %v3720_v50, %v3716_v33  ;;  %2722 = vadd.xlane.f32.xlu1 %v2721_v1 }
0x18b5   : > { %v2728_v26 = vpack.c.bf16 %v2726_v53, %v2726_v53 }
0x18b7   : > { %3579 = vmatmul.mubr.msk.bf16.vlgmr.msra.gmra.mrb[80].mxu0 %vm560_vm4, %v2728_v26  ;;  %v2925_v26 = vsub.s32 2, %v3920_v14 }
0x18b8   : > { %3590 = vmatprep.mubr.msk.bf16.mxu0 %vm3787_vm2, %v3786_v8  ;;  %3589 = vmatpush3.bf16.msra.mxu0 %v2831_v2 }
0x18b9   : > { %v2926_v16 = vrot.slane %v4127_v30, %v2925_v26 }
0x18c4   : > { %2778 = vrot.lane.b32.xlu1 %v4176_v28, %s3796_s14 }
0x1940   : > { %v2723_v43 = vpop.xlane.xlu1 %2722 }
0x1941   : > { %3721 = vrcp.f32 %v2723_v43 }
0x1944   : > { %v2779_v3 = vpop.permute.xlu1 %2778 }
0x1945   : > { %v2784_v4 = vsel %vm685_vm5, %v2779_v3, 0 }
0x1946   : > { %3583 = vmatpush3.bf16.msra.mxu1 %v2784_v4 }
0x1947   : > { %3594 = vmatprep.subr.bf16.mxu1 %v3786_v8 }
0x194b   : > { %v3722_v39 = vpop.eup %3721 }
0x194c   : > { %v2727_v5 = vmul.f32 %v3722_v39, %v3718_v0 }
0x194e   : > { %v2729_v22 = vpack.c.bf16 %v2727_v5, %v2727_v5 }
0x1950   : > { %3585 = vmatmul.mubr.msk.bf16.vlgmr.msra.gmra.mrb[80].mxu1 %vm560_vm4, %v2729_v22 }
0x1951   : > { %3598 = vmatprep.mubr.msk.bf16.mxu1 %vm3787_vm2, %v3786_v8 }
0x198a   : > { %v2772_v28 = vpop.f32.mrb[80].mxu0 }
0x198b   : > { %v3580_v6 = vpop.f32.mrb[81].mxu0 }
0x198c   : > { %v2775_v7 = vpop.f32.mrb[82].mxu0 }
0x198d   : > { %v3581_v9 = vpop.f32.mrb[83].mxu0 }
0x1a23   : > { %v2820_v12 = vpop.f32.mrb[80].mxu1 }
0x1a24   : > { %v2826_v31 = vpack.c.bf16 %v2820_v12, %v2772_v28  ;;  %v3586_v45 = vpop.f32.mrb[81].mxu1 }
0x1a25   : > { %v2823_v19 = vpop.f32.mrb[82].mxu1 }
0x1a26   : > { %v3587_v20 = vpop.f32.mrb[83].mxu1  ;;  %3591 = vmatmul.mubr.msk.bf16.vlgmr.msra.gmra.mrb[84].mxu0 %vm560_vm4, %v2826_v31 }
0x1af9   : > { %v2867_v18 = vpop.f32.mrb[84].mxu0 }
0x1afa   : > { %v2874_v21 = vadd.f32 %v2867_v18, %v2604_v15  ;;  %v3592_v23 = vpop.f32.mrb[85].mxu0 }
0x1afb   : > { %v2870_v24 = vpop.f32.mrb[86].mxu0 }
0x1afc   : > { %v2880_v27 = vadd.f32 %v2879_v25, %v2874_v21  ;;  %v2875_v29 = vadd.f32 %v2870_v24, %v2605_v10  ;;  %v3593_v32 = vpop.f32.mrb[87].mxu0  ;;  %v3654_v10 = vld [vmem:[%s3884_s26 + $0x28] sm:$0xff]  }
0x1afe   : > { %v2881_v35 = vadd.f32 %v2879_v25, %v2875_v29  ;;  %v2882_v36 = vadd.f32 %v2880_v27, %v4165_v13 }
0x1b00   : > { %v2884_v37 = vsel %vm504_vm3, %v2882_v36, 0.0  ;;  %v2883_v38 = vadd.f32 %v2881_v35, %v4167_v17  ;;  %v3653_v17 = vld [vmem:[%s3884_s26 + $0x20] sm:$0xff]   ;;  %s3799_s26 = smov [#allocation3]  }
0x1b01   : > { %2885 = vadd.xlane.f32.xlu1 %v2884_v37  ;;  %3595 = vmatpush3.bf16.msra.mxu1 %v3653_v17  ;;  %v3731_v37 = vld [vmem:[%s3879_s23] sm:$0xff]  ;;  %s3034_s20 = sshll.u32 %s3799_s26, 4  ;;  %s3035_s20 = int_to_ptr.vmem [resolvable:$true] %s3034_s20 }
0x1b02   : > { %v2887_v40 = vsel %vm504_vm3, %v2883_v38, 0.0  ;;  %3596 = vmatprep.subr.bf16.mxu1 %v3786_v8  ;;  %s3732_s18 = scalar_lea.vmem %s3035_s20, 256  ;;  %p3739_p10 = scmp.lt.s32.totalorder %s3035_s20, %s3035_s20 }
0x1b03   : > { %2888 = vadd.xlane.f32.xlu0 %v2887_v40  ;;  %p3733_p7 = scmp.ne.s32.totalorder %s3035_s20, %s3732_s18  ;;  %p3740_p11 = scmp.lt.s32.totalorder %s3732_s18, %s3732_s18 }
0x1b05   : > { %3597 = vmatpush3.bf16.msra.mxu1 %v3654_v10  ;;  %p3734_p8 = pnand %p3733_p7, %p4386_p6  ;;  %p3741_p12 = por %p3740_p11, %p3739_p10 }
0x1b07   : > { %p3735_p9 = pneg %p3734_p8 }
0x1b09   : > { %p3742_p13 = pnand %p3741_p12, %p3735_p9 }
0x1b8e   : > { %v2886_v57 = vpop.xlane.xlu1 %2885 }
0x1b8f   : > { %v2890_v41 = vmul.f32 0.03125, %v2886_v57 }
0x1b90   : > { %v2889_v42 = vpop.xlane.xlu0 %2888 }
0x1b91   : > { %v2892_v44 = vsub.f32 %v2882_v36, %v2890_v41  ;;  %v2891_v46 = vmul.f32 0.03125, %v2889_v42  ;;  %v3013_v36 = vsub.s32 7, %v3920_v14  ;;  %v3231_v42 = vld [vmem:[%s3879_s23 + $0x8] ss:$0 sm:$0xff] }
0x1b93   : > { %v2893_v47 = vsub.f32 %v2883_v38, %v2891_v46  ;;  %v2894_v15 = vmul.f32 %v2892_v44, %v2892_v44  ;;  %v3014_v38 = vrot.slane %v3731_v37, %v3013_v36 }
0x1b95   : > { %v2896_v49 = vsel %vm504_vm3, %v2894_v15, 0.0  ;;  %v2895_v13 = vmul.f32 %v2893_v47, %v2893_v47 }
0x1b96   : > { %2897 = vadd.xlane.f32.xlu0 %v2896_v49 }
0x1b97   : > { %v2899_v51 = vsel %vm504_vm3, %v2895_v13, 0.0 }
0x1b98   : > { %2900 = vadd.xlane.f32.xlu1 %v2899_v51 }
0x1c23   : > { %v2898_v34 = vpop.xlane.xlu0 %2897 }
0x1c24   : > { %v2902_v54 = vmul.f32 0.03125, %v2898_v34 }
0x1c25   : > { %v2901_v55 = vpop.xlane.xlu1 %2900 }
0x1c26   : > { %v2904_v11 = vadd.f32 1e-05, %v2902_v54  ;;  %v2903_v33 = vmul.f32 0.03125, %v2901_v55 }
0x1c28   : > { %3723 = vrsqrt.f32 %v2904_v11  ;;  %v2905_v56 = vadd.f32 1e-05, %v2903_v33 }
0x1c2a   : > { %3725 = vrsqrt.f32 %v2905_v56 }
0x1c32   : > { %v3724_v60 = vpop.eup %3723 }
0x1c33   : > { %v2908_v61 = vmul.f32 %v3724_v60, %v2892_v44 }
0x1c34   : > { %v3726_v62 = vpop.eup %3725 }
0x1c35   : > { %v2914_v52 = vmul.f32 %v2913_v59, %v2908_v61  ;;  %v2909_v8 = vmul.f32 %v3726_v62, %v2893_v47 }
0x1c37   : > { %v2915_v0 = vmul.f32 %v2913_v59, %v2909_v8  ;;  %v2920_v50 = vadd.f32 %v2919_v63, %v2914_v52 }
0x1c39   : > { %v2921_v1 = vadd.f32 %v2919_v63, %v2915_v0 }
0x1c3b   : > { %v2922_v53 = vpack.c.bf16 %v2921_v1, %v2920_v50 }
0x1c3d   : > { %3599 = vmatmul.mubr.msk.bf16.vlgmr.msra.gmra.mrb[84].mxu1 %vm504_vm3, %v2922_v53 }
0x1d10   : > { %v2976_v2 = vpop.f32.mrb[84].mxu1 }
0x1d11   : > { %v2977_v43 = vadd.f32 %v2976_v2, %v2926_v16  ;;  %v3600_v3 = vpop.f32.mrb[85].mxu1 }
0x1d12   : > { %v2979_v4 = vpop.f32.mrb[86].mxu1 }
0x1d13   : > { %v2980_v39 = vadd.f32 %v2979_v4, %v2926_v16  ;;  %v3601_v5 = vpop.f32.mrb[87].mxu1  ;;  %v2983_v22 = vadd.f32 %v2977_v43, %v2920_v50 }
0x1d15   : > { %v2985_v28 = vsel %vm504_vm3, %v2983_v22, 0.0  ;;  %v2984_v6 = vadd.f32 %v2980_v39, %v2921_v1 }
0x1d16   : > { %2986 = vadd.xlane.f32.xlu0 %v2985_v28 }
0x1d17   : > { %v2988_v7 = vsel %vm504_vm3, %v2984_v6, 0.0 }
0x1d18   : > { %2989 = vadd.xlane.f32.xlu1 %v2988_v7 }
0x1da3   : > { %v2987_v9 = vpop.xlane.xlu0 %2986 }
0x1da4   : > { %v2991_v12 = vmul.f32 0.03125, %v2987_v9 }
0x1da5   : > { %v2990_v31 = vpop.xlane.xlu1 %2989 }
0x1da6   : > { %v2993_v45 = vsub.f32 %v2983_v22, %v2991_v12  ;;  %v2992_v19 = vmul.f32 0.03125, %v2990_v31 }
0x1da8   : > { %v2994_v30 = vsub.f32 %v2984_v6, %v2992_v19  ;;  %v2995_v20 = vmul.f32 %v2993_v45, %v2993_v45 }
0x1daa   : > { %v2997_v25 = vsel %vm504_vm3, %v2995_v20, 0.0  ;;  %v2996_v18 = vmul.f32 %v2994_v30, %v2994_v30 }
0x1dab   : > { %2998 = vadd.xlane.f32.xlu0 %v2997_v25 }
0x1dac   : > { %v3000_v21 = vsel %vm504_vm3, %v2996_v18, 0.0 }
0x1dad   : > { %3001 = vadd.xlane.f32.xlu1 %v3000_v21 }
0x1e38   : > { %v2999_v23 = vpop.xlane.xlu0 %2998 }
0x1e39   : > { %v3003_v24 = vmul.f32 0.03125, %v2999_v23 }
0x1e3a   : > { %v3002_v27 = vpop.xlane.xlu1 %3001 }
0x1e3b   : > { %v3005_v29 = vadd.f32 1e-05, %v3003_v24  ;;  %v3004_v32 = vmul.f32 0.03125, %v3002_v27 }
0x1e3d   : > { %3727 = vrsqrt.f32 %v3005_v29  ;;  %v3006_v35 = vadd.f32 1e-05, %v3004_v32 }
0x1e3f   : > { %3729 = vrsqrt.f32 %v3006_v35 }
0x1e47   : > { %v3728_v40 = vpop.eup %3727 }
0x1e48   : > { %v3009_v57 = vmul.f32 %v3728_v40, %v2993_v45 }
0x1e49   : > { %v3730_v41 = vpop.eup %3729 }
0x1e4a   : > { %v3015_v44 = vmul.f32 %v3014_v38, %v3009_v57  ;;  %v3010_v46 = vmul.f32 %v3730_v41, %v2994_v30 }
0x1e4c   : > { %v3016_v47 = vmul.f32 %v3014_v38, %v3010_v46  ;;  %v3021_v15 = vadd.f32 %v3231_v42, %v3015_v44 }
0x1e4e   : > { %v3022_v49 = vadd.f32 %v3231_v42, %v3016_v47  ;;  %3023 = vst.msk [vmem:[#allocation3] sm:$0xff] %vm504_vm3, %v3021_v15 }
0x1e50   : > { %3024 = vst.msk [vmem:[#allocation3 + $0x8] sm:$0xff] %vm504_vm3, %v3022_v49 }
0x1e51   : > { %3745 = shalt.err (!%p3742_p13)
}
0x1e52   : > { %s3746_s22 = scalar_lea.hbm %s4431_s8, 256 }
0x1e53   : > { %p3747_p0 = scmp.ne.s32.totalorder %s4431_s8, %s3746_s22  ;;  %p3752_p3 = scmp.lt.u32.totalorder %s3746_s22, %s4431_s8 }
0x1e55   : > { %p3748_p1 = pnand %p3747_p0, %p4386_p6 }
0x1e57   : > { %p3749_p2 = pneg %p3748_p1 }
0x1e59   : > { %p3754_p4 = pnand %p3752_p3, %p3749_p2 }
0x1e5b   : > { %3757 = shalt.err (!%p3754_p4)
}
0x1e5c   : > { %s3800_s12 = smov 128   ;;  %s3801_s14 = smov 8  }
0x1e5d   : > { %3604 = dma.vmem_to_hbm [thread:$0]  (%p4386_p6), %s3035_s20, 256, %s4431_s8, [#allocation4], %s3800_s12, %s3800_s12, %s3801_s14  }
0x1e5e   : > { %3771 = dma.done.wait (%p4386_p6), [#allocation4], 256  }
0x1e5f   : > { %3773 = vsyncadd (%p4386_p6), [#allocation4], 4294967040 }
0x1e60 PF: > { %s19_s29 = sadd.s32 1, %s3784_s29   ;;  %s4433_s27 = smov %s3780_s28 }
0x1e61   : > { %p16_p5 = scmp.ge.s32.totalorder %s19_s29, 4   ;;  %s4434_s28 = smov %s4436_s9 }
0x1e63   :  { %18 = sbr.rel (!%p16_p5) target bundleno = 2 (0x2), region = 102 }
0x1e6a   :  { %3050 = vsyncpa [#allocation4], 1 }
0x1e6b   :  { %3052 = vsyncpa [#allocation4 + $0x1], 1 }

</bundles_post_ra>
